<compile_context>
chip_gen: v5e
topology: v5e:2x2
jax: 0.10.0
libtpu: 0.0.40
codegen_flags: <defaults>
</compile_context>

<pallas_src>
import functools

import jax
import jax.numpy as jnp
import numpy as np
from jax.experimental import pallas as pl
from jax.experimental.pallas import tpu as pltpu

_LANE = 128


def _ru(x, m):
    return (x + m - 1) // m * m


# ----------------------------- in-kernel math helpers -----------------------------

def _elu(x):
    # ELU(alpha=1): x if x > 0 else exp(x) - 1   (clamp arg of exp for safety)
    return jnp.where(x > 0.0, x, jnp.exp(jnp.minimum(x, 0.0)) - 1.0)


def _sigmoid(x):
    # 1 / (1 + exp(-x)) with the divide routed to the otherwise-idle EUP slot.
    return pl.reciprocal(1.0 + jnp.exp(-x), approx=True)


def _f32dot(a, b):
    return jnp.dot(a, b, preferred_element_type=jnp.float32)


# ----------------------------- the Pallas kernel -----------------------------

def _scm_kernel(flat_ref,
                m_wps, m_bps, m_wpost, m_bpost, m_wag, m_bag, m_g, m_b,
                e_wpre, e_bpre, e_wpost, e_bpost, e_wag, e_bag, e_g1, e_b1,
                seg_stat, seg_exp, seg_red,
                out_ref):
    flat_in = flat_ref[...]                   # (TB, F), source dtype (f32 or bf16)
    F = flat_in.shape[-1]
    H = e_g1.shape[-1]
    N = m_g.shape[-1]
    Hp, Np, Fp = _ru(H, _LANE), _ru(N, _LANE), _ru(F, _LANE)

    flat = flat_in.astype(jnp.float32)

    # ---- mlp_grn(flatten) -> variable-selection logits; softmax over static variables (f32) ----
    # fused [pre_act | skip] matmul, skip block starts at lane Hp (128-aligned split)
    sp = _f32dot(flat, m_wps[...]) + m_bps[...]                        # (TB, Hp+Np)
    skip = sp[:, Hp:Hp + N]                                            # (TB, N) skip_linear
    hid = _elu(sp[:, :H])                                              # (TB, H) pre_act + ELU
    hid = _f32dot(hid, m_wpost[...]) + m_bpost[...]                    # (TB, H) post_act
    ag = _f32dot(hid, m_wag[...]) + m_bag[...]                         # (TB, 2*Np) fused act|gate
    glu = ag[:, :N] * _sigmoid(ag[:, Np:Np + N])                       # (TB, N)  GLU

    z = skip + glu                                                     # add_and_norm
    mu = jnp.mean(z, axis=-1, keepdims=True)
    var = jnp.mean((z - mu) * (z - mu), axis=-1, keepdims=True)
    logits = (z - mu) * jax.lax.rsqrt(var + 1e-5) * m_g[...] + m_b[...]

    mx = jnp.max(logits, axis=-1, keepdims=True)
    ex = jnp.exp(logits - mx)
    w = ex * pl.reciprocal(jnp.sum(ex, axis=-1, keepdims=True), approx=True)   # (TB, N)

    # ---- emb_grn on all N static variables at once via block-diagonal weights (bf16 MXU) ----
    xb = flat_in.astype(jnp.bfloat16)
    h = _elu(_f32dot(xb, e_wpre[...]) + e_bpre[...])                   # (TB, F)
    h = _f32dot(h.astype(jnp.bfloat16), e_wpost[...]) + e_bpost[...]   # (TB, F)
    ag2 = _f32dot(h.astype(jnp.bfloat16), e_wag[...]) + e_bag[...]     # (TB, Fp+F) fused act|gate
    y = flat + ag2[:, :F] * _sigmoid(ag2[:, Fp:Fp + F])                # linear_skip: skip = input

    # ---- per-variable LayerNorm + weighted combine, algebraically folded ----
    # sum_i w_i * LN(y_i)*g + b  ==  g * (sum_i a_i*y_i - sum_i a_i*mean_i) + b,
    # with a_i = w_i * rstd_i and sum_i w_i = 1 (softmax).
    # One fused stats matmul on [y | y*y] (msq block starts at lane Np), one N->F expand,
    # one F->H segment reduce.
    # NOTE: one-pass variance (E[y^2]-mean^2) in f32; fine for normally-scaled embeddings.
    st = _f32dot(jnp.concatenate([y, y * y], axis=-1), seg_stat[...])  # (TB, Np+N)
    mean_s = st[:, :N]                                                 # (TB, N)
    msq_s = st[:, Np:Np + N]                                           # (TB, N)
    rstd_s = jax.lax.rsqrt(jnp.maximum(msq_s - mean_s * mean_s, 0.0) + 1e-5)
    a_s = w * rstd_s                                                   # (TB, N)
    c = jnp.sum(a_s * mean_s, axis=-1, keepdims=True)                  # (TB, 1)
    a_f = _f32dot(a_s, seg_exp[...])                                   # (TB, F) segment expand
    s1 = _f32dot(a_f * y, seg_red[...])                                # (TB, H) segment reduce
    vec = e_g1[...] * (s1 - c) + e_b1[...]                             # (TB, H) static_vec

    # single lane-dense packed output: [static_vec | sparse_weights]
    out_ref[...] = jnp.concatenate([vec, w], axis=-1)                  # (TB, H+N)


# ----------------------------- parameters -----------------------------

PARAM_ORDER = (
    "m_wskip", "m_bskip", "m_wpre", "m_bpre", "m_wpost", "m_bpost",
    "m_wact", "m_bact", "m_wgate", "m_bgate", "m_g", "m_b",
    "e_wpre", "e_bpre", "e_wpost", "e_bpost",
    "e_wact", "e_bact", "e_wgate", "e_bgate", "e_g", "e_b",
)

KERNEL_PARAM_ORDER = (
    "m_wps", "m_bps", "m_wpost", "m_bpost", "m_wag", "m_bag", "m_g", "m_b",
    "e_wpre", "e_bpre", "e_wpost", "e_bpost", "e_wag", "e_bag", "e_g1", "e_b1",
    "seg_stat", "seg_exp", "seg_red",
)


def init_params(key, num_static, hidden):
    """Deterministic synthetic weights.  Linear weights are stored as (in, out)
    (i.e. the transpose of torch's nn.Linear.weight); biases / LN params as (1, out)."""
    F = num_static * hidden
    shapes = {
        "m_wskip": (F, num_static), "m_bskip": (1, num_static),
        "m_wpre": (F, hidden), "m_bpre": (1, hidden),
        "m_wpost": (hidden, hidden), "m_bpost": (1, hidden),
        "m_wact": (hidden, num_static), "m_bact": (1, num_static),
        "m_wgate": (hidden, num_static), "m_bgate": (1, num_static),
        "m_g": (1, num_static), "m_b": (1, num_static),
        "e_wpre": (hidden, hidden), "e_bpre": (1, hidden),
        "e_wpost": (hidden, hidden), "e_bpost": (1, hidden),
        "e_wact": (hidden, hidden), "e_bact": (1, hidden),
        "e_wgate": (hidden, hidden), "e_bgate": (1, hidden),
        "e_g": (1, hidden), "e_b": (1, hidden),
    }
    params = {}
    keys = jax.random.split(key, len(PARAM_ORDER))
    for k_, name in zip(keys, PARAM_ORDER):
        shp = shapes[name]
        if name in ("m_g", "e_g"):                       # LayerNorm gamma
            params[name] = jnp.ones(shp, jnp.float32)
        elif name in ("m_b", "e_b"):                     # LayerNorm beta
            params[name] = jnp.zeros(shp, jnp.float32)
        elif name[2] == "w":                             # Linear weight
            params[name] = 0.1 * jax.random.normal(k_, shp, jnp.float32)
        else:                                            # Linear bias
            params[name] = 0.01 * jax.random.normal(k_, shp, jnp.float32)
    return params


def _pad_cols(blocks, width):
    """Place (col_offset, (rows, cols) array) blocks into a zero (rows, width) f32 array."""
    rows = blocks[0][1].shape[0]
    out = jnp.zeros((rows, width), jnp.float32)
    for off, a in blocks:
        out = out.at[:, off:off + a.shape[1]].set(a.astype(jnp.float32))
    return out


def _pad_rc(blocks, rows, cols):
    """Place (row_off, col_off, array) blocks into a zero (rows, cols) f32 array."""
    out = jnp.zeros((rows, cols), jnp.float32)
    for r, c, a in blocks:
        out = out.at[r:r + a.shape[0], c:c + a.shape[1]].set(a.astype(jnp.float32))
    return out


def _prepare_kernel_params(p, N, H):
    """Fuse / pad / block-diagonalize the raw per-module weights for the kernel layout.
    All fused splits are padded so every slice in the kernel starts at a 128-lane boundary."""
    F = N * H
    Hp, Np, Fp = _ru(H, _LANE), _ru(N, _LANE), _ru(F, _LANE)
    eyeN = jnp.eye(N, dtype=jnp.float32)

    def bd(w):     # replicate an (H, X) weight block-diagonally -> (N*H, N*X)
        return jnp.kron(eyeN, w)

    def tile_bias(b):
        return jnp.tile(b, (1, N))

    seg_avg = jnp.kron(eyeN, jnp.ones((H, 1), jnp.float32) / H)        # (F, N) per-block mean

    kp = {
        # mlp_grn (variable-selection logits), f32
        "m_wps": _pad_cols([(0, p["m_wpre"]), (Hp, p["m_wskip"])], Hp + Np),   # (F, Hp+Np)
        "m_bps": _pad_cols([(0, p["m_bpre"]), (Hp, p["m_bskip"])], Hp + Np),
        "m_wpost": p["m_wpost"], "m_bpost": p["m_bpost"],
        "m_wag": _pad_cols([(0, p["m_wact"]), (Np, p["m_wgate"])], 2 * Np),    # (H, 2*Np)
        "m_bag": _pad_cols([(0, p["m_bact"]), (Np, p["m_bgate"])], 2 * Np),
        "m_g": p["m_g"], "m_b": p["m_b"],
        # emb_grn, block-diagonal over the N static variables, bf16 MXU operands
        "e_wpre": bd(p["e_wpre"]).astype(jnp.bfloat16),                        # (F, F)
        "e_bpre": tile_bias(p["e_bpre"]),
        "e_wpost": bd(p["e_wpost"]).astype(jnp.bfloat16),                      # (F, F)
        "e_bpost": tile_bias(p["e_bpost"]),
        "e_wag": _pad_cols([(0, bd(p["e_wact"])), (Fp, bd(p["e_wgate"]))],
                           Fp + F).astype(jnp.bfloat16),                       # (F, Fp+F)
        "e_bag": _pad_cols([(0, tile_bias(p["e_bact"])), (Fp, tile_bias(p["e_bgate"]))], Fp + F),
        "e_g1": p["e_g"], "e_b1": p["e_b"],                                    # (1, H) untiled
        # segment helpers: fused mean|E[y^2] stats, segment expand, segment reduce
        "seg_stat": _pad_rc([(0, 0, seg_avg), (F, Np, seg_avg)], 2 * F, Np + N),
        "seg_exp": jnp.kron(eyeN, jnp.ones((1, H), jnp.float32)),              # (N, F)
        "seg_red": jnp.kron(jnp.ones((N, 1), jnp.float32),
                            jnp.eye(H, dtype=jnp.float32)),                    # (F, H)
    }
    return kp


# ----------------------------- wrapper -----------------------------

def static_combine_and_mask_forward(embedding, params, *, tile_b_target=512):
    """Returns (static_vec (B, H), sparse_weights (B, N, 1)) like the PyTorch module."""
    B, N, H = embedding.shape
    F = N * H
    Hp, Np, Fp = _ru(H, _LANE), _ru(N, _LANE), _ru(F, _LANE)

    # torch.flatten(embedding, start_dim=1); keep source dtype (bf16 input stays bf16 for DMA)
    x = embedding.reshape(B, F)
    in_itemsize = jnp.dtype(x.dtype).itemsize

    kp = _prepare_kernel_params(params, N, H)
    kparams = [kp[k] for k in KERNEL_PARAM_ORDER]
    weight_bytes = sum(int(np.prod(a.shape)) * jnp.dtype(a.dtype).itemsize for a in kparams)

    # Batch tile: multiple of 8 sublanes; aim for >= 4 grid tiles so the "parallel" batch axis
    # actually shards across v7x's two TensorCores (harmless single-TC on v5e/v6e).
    B8 = _ru(B, 8)
    tile_b = max(8, min(tile_b_target, _ru(pl.cdiv(B8, 4), 8)))

    # Derive the VMEM footprint and keep it inside a 44 MiB budget (headroom under v7x's
    # 64 MiB physical VMEM): 2x double-buffered input tile + 2x output tile + 1x resident
    # weights (Buffered(1)) + a rough bound on live f32 intermediates.
    wide = max(Fp + F, Hp + Np, 2 * Np, 2 * F)

    def vmem_estimate(tb):
        io = 2 * tb * F * in_itemsize + 2 * tb * (H + N) * 4
        interm = 10 * tb * wide * 4
        return weight_bytes + io + interm

    budget = 44 * 1024 * 1024
    if weight_bytes > budget:
        # TODO(synk): switch emb_grn to the per-variable batched formulation for large F.
        raise ValueError(
            f"Resident weights ({weight_bytes/2**20:.1f} MiB) exceed the VMEM budget; "
            f"F=N*H={F} is too large for the block-diagonal emb_grn formulation.")
    while vmem_estimate(tile_b) > budget and tile_b > 8:
        tile_b = max(8, _ru(tile_b // 2, 8))

    Bp = _ru(B8, tile_b)
    if Bp != B:
        x = jnp.pad(x, ((0, Bp - B), (0, 0)))

    vmem_limit = int(min(60 * 2**20, max(32 * 2**20, vmem_estimate(tile_b) + 8 * 2**20)))

    def _resident(a):            # constant-index weights: single-buffered, VMEM-resident
        return pl.BlockSpec(a.shape, lambda i: (0, 0), pipeline_mode=pl.Buffered(1))

    in_specs = [pl.BlockSpec((tile_b, F), lambda i: (i, 0))] + [_resident(a) for a in kparams]
    out_specs = pl.BlockSpec((tile_b, H + N), lambda i: (i, 0))

    # Useful FLOPs only (block-diagonal zero-MACs / lane padding excluded); advisory hint.
    flops = (2 * Bp * (F * (H + N) + H * H + 2 * H * N)   # mlp_grn
             + Bp * 8 * F * H                             # emb_grn (per-variable useful work)
             + Bp * 8 * F)                                # LN stats / expand / combine
    bytes_accessed = Bp * F * in_itemsize + weight_bytes + Bp * (H + N) * 4
    transcendentals = Bp * (2 * F + H + 4 * N)

    out = pl.pallas_call(
        _scm_kernel,
        out_shape=jax.ShapeDtypeStruct((Bp, H + N), jnp.float32),
        grid_spec=pltpu.PrefetchScalarGridSpec(
            num_scalar_prefetch=0,
            grid=(Bp // tile_b,),
            in_specs=in_specs,
            out_specs=out_specs),
        compiler_params=pltpu.CompilerParams(
            dimension_semantics=("parallel",),          # shard batch tiles across v7x's 2 TCs
            vmem_limit_bytes=vmem_limit),
        cost_estimate=pl.CostEstimate(flops=int(flops),
                                      transcendentals=int(transcendentals),
                                      bytes_accessed=int(bytes_accessed)),
    )(x, *kparams)

    static_vec = out[:B, :H]
    sparse_weights = out[:B, H:H + N][:, :, None]       # torch.unsqueeze(sparse_weights, dim=-1)
    return static_vec, sparse_weights


# ----------------------------- pure-JAX reference (for checking) -----------------------------

def _reference(embedding, p):
    B, N, H = embedding.shape
    dot = functools.partial(jnp.dot, precision=jax.lax.Precision.HIGHEST)

    def ln(x, g, b):
        mu = x.mean(-1, keepdims=True)
        var = ((x - mu) ** 2).mean(-1, keepdims=True)
        return (x - mu) / jnp.sqrt(var + 1e-5) * g + b

    flat = embedding.reshape(B, N * H)
    skip = dot(flat, p["m_wskip"]) + p["m_bskip"]
    hidden = jax.nn.elu(dot(flat, p["m_wpre"]) + p["m_bpre"])
    hidden = dot(hidden, p["m_wpost"]) + p["m_bpost"]
    act = dot(hidden, p["m_wact"]) + p["m_bact"]
    gate = jax.nn.sigmoid(dot(hidden, p["m_wgate"]) + p["m_bgate"])
    logits = ln(skip + act * gate, p["m_g"], p["m_b"])
    w = jax.nn.softmax(logits, axis=-1)[:, :, None]

    x = embedding
    h = jax.nn.elu(dot(x, p["e_wpre"]) + p["e_bpre"])
    h = dot(h, p["e_wpost"]) + p["e_bpost"]
    a = dot(h, p["e_wact"]) + p["e_bact"]
    g = jax.nn.sigmoid(dot(h, p["e_wgate"]) + p["e_bgate"])
    trans = ln(x + a * g, p["e_g"], p["e_b"])

    vec = jnp.sum(w * trans, axis=1)
    return vec, w


# ----------------------------- main -----------------------------

if __name__ == "__main__":
    B, N, H = 2, 4, 32          # batch, num_static, hidden_layer_size
    key = jax.random.PRNGKey(0)
    k_emb, k_par = jax.random.split(key)

    embedding = jax.random.normal(k_emb, (B, N, H), jnp.float32)
    params = init_params(k_par, N, H)

    vec, sparse_weights = static_combine_and_mask_forward(embedding, params)
    jax.block_until_ready((vec, sparse_weights))

    assert vec.shape == (B, H)
    assert sparse_weights.shape == (B, N, 1)

    ref_vec, ref_w = _reference(embedding, params)
    # bf16 MXU operands on the emb_grn path -> slightly looser tolerance than pure-f32.
    np.testing.assert_allclose(np.asarray(vec), np.asarray(ref_vec), atol=2e-2, rtol=2e-2)
    np.testing.assert_allclose(np.asarray(sparse_weights), np.asarray(ref_w), atol=2e-2, rtol=2e-2)

    print("KERNEL_OK")
</pallas_src>

<mosaic_0001>
module attributes {stable_mosaic.version = 11 : i64} {
  func.func @_scm_kernel(%arg0: i32, %arg1: memref<8x128xf32, #tpu.memory_space<vmem>>, %arg2: memref<128x256xf32, #tpu.memory_space<vmem>>, %arg3: memref<1x256xf32, #tpu.memory_space<vmem>>, %arg4: memref<32x32xf32, #tpu.memory_space<vmem>>, %arg5: memref<1x32xf32, #tpu.memory_space<vmem>>, %arg6: memref<32x256xf32, #tpu.memory_space<vmem>>, %arg7: memref<1x256xf32, #tpu.memory_space<vmem>>, %arg8: memref<1x4xf32, #tpu.memory_space<vmem>>, %arg9: memref<1x4xf32, #tpu.memory_space<vmem>>, %arg10: memref<128x128xbf16, #tpu.memory_space<vmem>>, %arg11: memref<1x128xf32, #tpu.memory_space<vmem>>, %arg12: memref<128x128xbf16, #tpu.memory_space<vmem>>, %arg13: memref<1x128xf32, #tpu.memory_space<vmem>>, %arg14: memref<128x256xbf16, #tpu.memory_space<vmem>>, %arg15: memref<1x256xf32, #tpu.memory_space<vmem>>, %arg16: memref<1x32xf32, #tpu.memory_space<vmem>>, %arg17: memref<1x32xf32, #tpu.memory_space<vmem>>, %arg18: memref<256x132xf32, #tpu.memory_space<vmem>>, %arg19: memref<4x128xf32, #tpu.memory_space<vmem>>, %arg20: memref<128x32xf32, #tpu.memory_space<vmem>>, %arg21: memref<8x36xf32, #tpu.memory_space<vmem>>) attributes {dimension_semantics = [#tpu.dimension_semantics<parallel>], iteration_bounds = array<i64: 1>, scalar_prefetch = 0 : i64, scratch_operands = 0 : i64, tpu.core_type = #tpu.core_type<tc>, window_params = [{transform_indices = @transform_0, window_bounds = array<i64: 8, 128>}, {pipeline_mode = #tpu.pipeline_mode<synchronous>, transform_indices = @transform_1, window_bounds = array<i64: 128, 256>}, {pipeline_mode = #tpu.pipeline_mode<synchronous>, transform_indices = @transform_2, window_bounds = array<i64: 1, 256>}, {pipeline_mode = #tpu.pipeline_mode<synchronous>, transform_indices = @transform_3, window_bounds = array<i64: 32, 32>}, {pipeline_mode = #tpu.pipeline_mode<synchronous>, transform_indices = @transform_4, window_bounds = array<i64: 1, 32>}, {pipeline_mode = #tpu.pipeline_mode<synchronous>, transform_indices = @transform_5, window_bounds = array<i64: 32, 256>}, {pipeline_mode = #tpu.pipeline_mode<synchronous>, transform_indices = @transform_6, window_bounds = array<i64: 1, 256>}, {pipeline_mode = #tpu.pipeline_mode<synchronous>, transform_indices = @transform_7, window_bounds = array<i64: 1, 4>}, {pipeline_mode = #tpu.pipeline_mode<synchronous>, transform_indices = @transform_8, window_bounds = array<i64: 1, 4>}, {pipeline_mode = #tpu.pipeline_mode<synchronous>, transform_indices = @transform_9, window_bounds = array<i64: 128, 128>}, {pipeline_mode = #tpu.pipeline_mode<synchronous>, transform_indices = @transform_10, window_bounds = array<i64: 1, 128>}, {pipeline_mode = #tpu.pipeline_mode<synchronous>, transform_indices = @transform_11, window_bounds = array<i64: 128, 128>}, {pipeline_mode = #tpu.pipeline_mode<synchronous>, transform_indices = @transform_12, window_bounds = array<i64: 1, 128>}, {pipeline_mode = #tpu.pipeline_mode<synchronous>, transform_indices = @transform_13, window_bounds = array<i64: 128, 256>}, {pipeline_mode = #tpu.pipeline_mode<synchronous>, transform_indices = @transform_14, window_bounds = array<i64: 1, 256>}, {pipeline_mode = #tpu.pipeline_mode<synchronous>, transform_indices = @transform_15, window_bounds = array<i64: 1, 32>}, {pipeline_mode = #tpu.pipeline_mode<synchronous>, transform_indices = @transform_16, window_bounds = array<i64: 1, 32>}, {pipeline_mode = #tpu.pipeline_mode<synchronous>, transform_indices = @transform_17, window_bounds = array<i64: 256, 132>}, {pipeline_mode = #tpu.pipeline_mode<synchronous>, transform_indices = @transform_18, window_bounds = array<i64: 4, 128>}, {pipeline_mode = #tpu.pipeline_mode<synchronous>, transform_indices = @transform_19, window_bounds = array<i64: 128, 32>}, {transform_indices = @transform_20, window_bounds = array<i64: 8, 36>}]} {
    %c0 = arith.constant 0 : index
    %c0_0 = arith.constant 0 : index
    %0 = vector.load %arg1[%c0, %c0_0] : memref<8x128xf32, #tpu.memory_space<vmem>>, vector<8x128xf32>
    %c0_1 = arith.constant 0 : index
    %c0_2 = arith.constant 0 : index
    %1 = vector.load %arg2[%c0_1, %c0_2] : memref<128x256xf32, #tpu.memory_space<vmem>>, vector<128x256xf32>
    %cst = arith.constant dense<0.000000e+00> : vector<8x256xf32>
    %2 = tpu.matmul %0, %1, %cst {dimension_numbers = #tpu.dot_dimension_numbers<[1], [0], [0], [1], [0, 0, 1, 1], [], []>} : vector<8x128xf32>, vector<128x256xf32>, vector<8x256xf32> -> vector<8x256xf32>
    %c0_3 = arith.constant 0 : index
    %c0_4 = arith.constant 0 : index
    %3 = vector.load %arg3[%c0_3, %c0_4] : memref<1x256xf32, #tpu.memory_space<vmem>>, vector<1x256xf32>
    %4 = vector.broadcast %3 : vector<1x256xf32> to vector<8x256xf32>
    %5 = arith.addf %2, %4 : vector<8x256xf32>
    %6 = vector.extract_strided_slice %5 {offsets = [0, 128], sizes = [8, 4], strides = [1, 1]} : vector<8x256xf32> to vector<8x4xf32>
    %7 = vector.extract_strided_slice %5 {offsets = [0, 0], sizes = [8, 32], strides = [1, 1]} : vector<8x256xf32> to vector<8x32xf32>
    %cst_5 = arith.constant 0.000000e+00 : f32
    %8 = vector.broadcast %cst_5 : f32 to vector<8x32xf32>
    %9 = arith.cmpf ogt, %7, %8 : vector<8x32xf32>
    %cst_6 = arith.constant 0.000000e+00 : f32
    %10 = vector.broadcast %cst_6 : f32 to vector<8x32xf32>
    %11 = arith.minimumf %7, %10 : vector<8x32xf32>
    %12 = math.exp %11 : vector<8x32xf32>
    %cst_7 = arith.constant 1.000000e+00 : f32
    %13 = vector.broadcast %cst_7 : f32 to vector<8x32xf32>
    %14 = arith.subf %12, %13 : vector<8x32xf32>
    %15 = arith.select %9, %7, %14 : vector<8x32xi1>, vector<8x32xf32>
    %c0_8 = arith.constant 0 : index
    %c0_9 = arith.constant 0 : index
    %16 = vector.load %arg4[%c0_8, %c0_9] : memref<32x32xf32, #tpu.memory_space<vmem>>, vector<32x32xf32>
    %cst_10 = arith.constant dense<0.000000e+00> : vector<8x32xf32>
    %17 = tpu.matmul %15, %16, %cst_10 {dimension_numbers = #tpu.dot_dimension_numbers<[1], [0], [0], [1], [0, 0, 1, 1], [], []>} : vector<8x32xf32>, vector<32x32xf32>, vector<8x32xf32> -> vector<8x32xf32>
    %c0_11 = arith.constant 0 : index
    %c0_12 = arith.constant 0 : index
    %18 = vector.load %arg5[%c0_11, %c0_12] : memref<1x32xf32, #tpu.memory_space<vmem>>, vector<1x32xf32>
    %19 = vector.broadcast %18 : vector<1x32xf32> to vector<8x32xf32>
    %20 = arith.addf %17, %19 : vector<8x32xf32>
    %c0_13 = arith.constant 0 : index
    %c0_14 = arith.constant 0 : index
    %21 = vector.load %arg6[%c0_13, %c0_14] : memref<32x256xf32, #tpu.memory_space<vmem>>, vector<32x256xf32>
    %cst_15 = arith.constant dense<0.000000e+00> : vector<8x256xf32>
    %22 = tpu.matmul %20, %21, %cst_15 {dimension_numbers = #tpu.dot_dimension_numbers<[1], [0], [0], [1], [0, 0, 1, 1], [], []>} : vector<8x32xf32>, vector<32x256xf32>, vector<8x256xf32> -> vector<8x256xf32>
    %c0_16 = arith.constant 0 : index
    %c0_17 = arith.constant 0 : index
    %23 = vector.load %arg7[%c0_16, %c0_17] : memref<1x256xf32, #tpu.memory_space<vmem>>, vector<1x256xf32>
    %24 = vector.broadcast %23 : vector<1x256xf32> to vector<8x256xf32>
    %25 = arith.addf %22, %24 : vector<8x256xf32>
    %26 = vector.extract_strided_slice %25 {offsets = [0, 0], sizes = [8, 4], strides = [1, 1]} : vector<8x256xf32> to vector<8x4xf32>
    %27 = vector.extract_strided_slice %25 {offsets = [0, 128], sizes = [8, 4], strides = [1, 1]} : vector<8x256xf32> to vector<8x4xf32>
    %cst_18 = arith.constant 0.000000e+00 : f32
    %28 = vector.broadcast %cst_18 : f32 to vector<8x4xf32>
    %29 = arith.subf %28, %27 : vector<8x4xf32>
    %30 = math.exp %29 : vector<8x4xf32>
    %cst_19 = arith.constant 1.000000e+00 : f32
    %31 = vector.broadcast %cst_19 : f32 to vector<8x4xf32>
    %32 = arith.addf %31, %30 : vector<8x4xf32>
    %33 = tpu.reciprocal %32 {approx = true} : vector<8x4xf32> -> vector<8x4xf32>
    %34 = arith.mulf %26, %33 : vector<8x4xf32>
    %35 = arith.addf %6, %34 : vector<8x4xf32>
    %cst_20 = arith.constant dense<0.000000e+00> : vector<8xf32>
    %36 = vector.multi_reduction <add>, %35, %cst_20 [1] : vector<8x4xf32> to vector<8xf32>
    %37 = vector.shape_cast %36 : vector<8xf32> to vector<8x1xf32>
    %cst_21 = arith.constant 4.000000e+00 : f32
    %38 = vector.broadcast %cst_21 : f32 to vector<8x1xf32>
    %39 = arith.divf %37, %38 : vector<8x1xf32>
    %40 = vector.broadcast %39 : vector<8x1xf32> to vector<8x4xf32>
    %41 = arith.subf %35, %40 : vector<8x4xf32>
    %42 = vector.broadcast %39 : vector<8x1xf32> to vector<8x4xf32>
    %43 = arith.subf %35, %42 : vector<8x4xf32>
    %44 = arith.mulf %41, %43 : vector<8x4xf32>
    %cst_22 = arith.constant dense<0.000000e+00> : vector<8xf32>
    %45 = vector.multi_reduction <add>, %44, %cst_22 [1] : vector<8x4xf32> to vector<8xf32>
    %46 = vector.shape_cast %45 : vector<8xf32> to vector<8x1xf32>
    %cst_23 = arith.constant 4.000000e+00 : f32
    %47 = vector.broadcast %cst_23 : f32 to vector<8x1xf32>
    %48 = arith.divf %46, %47 : vector<8x1xf32>
    %49 = vector.broadcast %39 : vector<8x1xf32> to vector<8x4xf32>
    %50 = arith.subf %35, %49 : vector<8x4xf32>
    %cst_24 = arith.constant 9.99999974E-6 : f32
    %51 = vector.broadcast %cst_24 : f32 to vector<8x1xf32>
    %52 = arith.addf %48, %51 : vector<8x1xf32>
    %53 = math.rsqrt %52 : vector<8x1xf32>
    %54 = vector.broadcast %53 : vector<8x1xf32> to vector<8x4xf32>
    %55 = arith.mulf %50, %54 : vector<8x4xf32>
    %c0_25 = arith.constant 0 : index
    %c0_26 = arith.constant 0 : index
    %56 = vector.load %arg8[%c0_25, %c0_26] : memref<1x4xf32, #tpu.memory_space<vmem>>, vector<1x4xf32>
    %57 = vector.broadcast %56 : vector<1x4xf32> to vector<8x4xf32>
    %58 = arith.mulf %55, %57 : vector<8x4xf32>
    %c0_27 = arith.constant 0 : index
    %c0_28 = arith.constant 0 : index
    %59 = vector.load %arg9[%c0_27, %c0_28] : memref<1x4xf32, #tpu.memory_space<vmem>>, vector<1x4xf32>
    %60 = vector.broadcast %59 : vector<1x4xf32> to vector<8x4xf32>
    %61 = arith.addf %58, %60 : vector<8x4xf32>
    %cst_29 = arith.constant dense<0xFF800000> : vector<8xf32>
    %62 = vector.multi_reduction <maximumf>, %61, %cst_29 [1] : vector<8x4xf32> to vector<8xf32>
    %63 = vector.shape_cast %62 : vector<8xf32> to vector<8x1xf32>
    %64 = vector.broadcast %63 : vector<8x1xf32> to vector<8x4xf32>
    %65 = arith.subf %61, %64 : vector<8x4xf32>
    %66 = math.exp %65 : vector<8x4xf32>
    %cst_30 = arith.constant dense<0.000000e+00> : vector<8xf32>
    %67 = vector.multi_reduction <add>, %66, %cst_30 [1] : vector<8x4xf32> to vector<8xf32>
    %68 = vector.shape_cast %67 : vector<8xf32> to vector<8x1xf32>
    %69 = tpu.reciprocal %68 {approx = true} : vector<8x1xf32> -> vector<8x1xf32>
    %70 = vector.broadcast %69 : vector<8x1xf32> to vector<8x4xf32>
    %71 = arith.mulf %66, %70 : vector<8x4xf32>
    %72 = arith.truncf %0 : vector<8x128xf32> to vector<8x128xbf16>
    %c0_31 = arith.constant 0 : index
    %c0_32 = arith.constant 0 : index
    %73 = vector.load %arg10[%c0_31, %c0_32] : memref<128x128xbf16, #tpu.memory_space<vmem>>, vector<128x128xbf16>
    %cst_33 = arith.constant dense<0.000000e+00> : vector<8x128xf32>
    %74 = tpu.matmul %72, %73, %cst_33 {dimension_numbers = #tpu.dot_dimension_numbers<[1], [0], [0], [1], [0, 0, 1, 1], [], []>} : vector<8x128xbf16>, vector<128x128xbf16>, vector<8x128xf32> -> vector<8x128xf32>
    %c0_34 = arith.constant 0 : index
    %c0_35 = arith.constant 0 : index
    %75 = vector.load %arg11[%c0_34, %c0_35] : memref<1x128xf32, #tpu.memory_space<vmem>>, vector<1x128xf32>
    %76 = vector.broadcast %75 : vector<1x128xf32> to vector<8x128xf32>
    %77 = arith.addf %74, %76 : vector<8x128xf32>
    %cst_36 = arith.constant 0.000000e+00 : f32
    %78 = vector.broadcast %cst_36 : f32 to vector<8x128xf32>
    %79 = arith.cmpf ogt, %77, %78 : vector<8x128xf32>
    %cst_37 = arith.constant 0.000000e+00 : f32
    %80 = vector.broadcast %cst_37 : f32 to vector<8x128xf32>
    %81 = arith.minimumf %77, %80 : vector<8x128xf32>
    %82 = math.exp %81 : vector<8x128xf32>
    %cst_38 = arith.constant 1.000000e+00 : f32
    %83 = vector.broadcast %cst_38 : f32 to vector<8x128xf32>
    %84 = arith.subf %82, %83 : vector<8x128xf32>
    %85 = arith.select %79, %77, %84 : vector<8x128xi1>, vector<8x128xf32>
    %86 = arith.truncf %85 : vector<8x128xf32> to vector<8x128xbf16>
    %c0_39 = arith.constant 0 : index
    %c0_40 = arith.constant 0 : index
    %87 = vector.load %arg12[%c0_39, %c0_40] : memref<128x128xbf16, #tpu.memory_space<vmem>>, vector<128x128xbf16>
    %cst_41 = arith.constant dense<0.000000e+00> : vector<8x128xf32>
    %88 = tpu.matmul %86, %87, %cst_41 {dimension_numbers = #tpu.dot_dimension_numbers<[1], [0], [0], [1], [0, 0, 1, 1], [], []>} : vector<8x128xbf16>, vector<128x128xbf16>, vector<8x128xf32> -> vector<8x128xf32>
    %c0_42 = arith.constant 0 : index
    %c0_43 = arith.constant 0 : index
    %89 = vector.load %arg13[%c0_42, %c0_43] : memref<1x128xf32, #tpu.memory_space<vmem>>, vector<1x128xf32>
    %90 = vector.broadcast %89 : vector<1x128xf32> to vector<8x128xf32>
    %91 = arith.addf %88, %90 : vector<8x128xf32>
    %92 = arith.truncf %91 : vector<8x128xf32> to vector<8x128xbf16>
    %c0_44 = arith.constant 0 : index
    %c0_45 = arith.constant 0 : index
    %93 = vector.load %arg14[%c0_44, %c0_45] : memref<128x256xbf16, #tpu.memory_space<vmem>>, vector<128x256xbf16>
    %cst_46 = arith.constant dense<0.000000e+00> : vector<8x256xf32>
    %94 = tpu.matmul %92, %93, %cst_46 {dimension_numbers = #tpu.dot_dimension_numbers<[1], [0], [0], [1], [0, 0, 1, 1], [], []>} : vector<8x128xbf16>, vector<128x256xbf16>, vector<8x256xf32> -> vector<8x256xf32>
    %c0_47 = arith.constant 0 : index
    %c0_48 = arith.constant 0 : index
    %95 = vector.load %arg15[%c0_47, %c0_48] : memref<1x256xf32, #tpu.memory_space<vmem>>, vector<1x256xf32>
    %96 = vector.broadcast %95 : vector<1x256xf32> to vector<8x256xf32>
    %97 = arith.addf %94, %96 : vector<8x256xf32>
    %98 = vector.extract_strided_slice %97 {offsets = [0, 0], sizes = [8, 128], strides = [1, 1]} : vector<8x256xf32> to vector<8x128xf32>
    %99 = vector.extract_strided_slice %97 {offsets = [0, 128], sizes = [8, 128], strides = [1, 1]} : vector<8x256xf32> to vector<8x128xf32>
    %cst_49 = arith.constant 0.000000e+00 : f32
    %100 = vector.broadcast %cst_49 : f32 to vector<8x128xf32>
    %101 = arith.subf %100, %99 : vector<8x128xf32>
    %102 = math.exp %101 : vector<8x128xf32>
    %cst_50 = arith.constant 1.000000e+00 : f32
    %103 = vector.broadcast %cst_50 : f32 to vector<8x128xf32>
    %104 = arith.addf %103, %102 : vector<8x128xf32>
    %105 = tpu.reciprocal %104 {approx = true} : vector<8x128xf32> -> vector<8x128xf32>
    %106 = arith.mulf %98, %105 : vector<8x128xf32>
    %107 = arith.addf %0, %106 : vector<8x128xf32>
    %108 = arith.mulf %107, %107 : vector<8x128xf32>
    %109 = tpu.concatenate %107, %108 in 1 : vector<8x128xf32>, vector<8x128xf32> -> vector<8x256xf32>
    %c0_51 = arith.constant 0 : index
    %c0_52 = arith.constant 0 : index
    %110 = vector.load %arg18[%c0_51, %c0_52] : memref<256x132xf32, #tpu.memory_space<vmem>>, vector<256x132xf32>
    %cst_53 = arith.constant dense<0.000000e+00> : vector<8x132xf32>
    %111 = tpu.matmul %109, %110, %cst_53 {dimension_numbers = #tpu.dot_dimension_numbers<[1], [0], [0], [1], [0, 0, 1, 1], [], []>} : vector<8x256xf32>, vector<256x132xf32>, vector<8x132xf32> -> vector<8x132xf32>
    %112 = vector.extract_strided_slice %111 {offsets = [0, 0], sizes = [8, 4], strides = [1, 1]} : vector<8x132xf32> to vector<8x4xf32>
    %113 = vector.extract_strided_slice %111 {offsets = [0, 128], sizes = [8, 4], strides = [1, 1]} : vector<8x132xf32> to vector<8x4xf32>
    %114 = arith.mulf %112, %112 : vector<8x4xf32>
    %115 = arith.subf %113, %114 : vector<8x4xf32>
    %cst_54 = arith.constant 0.000000e+00 : f32
    %116 = vector.broadcast %cst_54 : f32 to vector<8x4xf32>
    %117 = arith.maximumf %115, %116 : vector<8x4xf32>
    %cst_55 = arith.constant 9.99999974E-6 : f32
    %118 = vector.broadcast %cst_55 : f32 to vector<8x4xf32>
    %119 = arith.addf %117, %118 : vector<8x4xf32>
    %120 = math.rsqrt %119 : vector<8x4xf32>
    %121 = arith.mulf %71, %120 : vector<8x4xf32>
    %122 = arith.mulf %121, %112 : vector<8x4xf32>
    %cst_56 = arith.constant dense<0.000000e+00> : vector<8xf32>
    %123 = vector.multi_reduction <add>, %122, %cst_56 [1] : vector<8x4xf32> to vector<8xf32>
    %124 = vector.shape_cast %123 : vector<8xf32> to vector<8x1xf32>
    %c0_57 = arith.constant 0 : index
    %c0_58 = arith.constant 0 : index
    %125 = vector.load %arg19[%c0_57, %c0_58] : memref<4x128xf32, #tpu.memory_space<vmem>>, vector<4x128xf32>
    %cst_59 = arith.constant dense<0.000000e+00> : vector<8x128xf32>
    %126 = tpu.matmul %121, %125, %cst_59 {dimension_numbers = #tpu.dot_dimension_numbers<[1], [0], [0], [1], [0, 0, 1, 1], [], []>} : vector<8x4xf32>, vector<4x128xf32>, vector<8x128xf32> -> vector<8x128xf32>
    %127 = arith.mulf %126, %107 : vector<8x128xf32>
    %c0_60 = arith.constant 0 : index
    %c0_61 = arith.constant 0 : index
    %128 = vector.load %arg20[%c0_60, %c0_61] : memref<128x32xf32, #tpu.memory_space<vmem>>, vector<128x32xf32>
    %cst_62 = arith.constant dense<0.000000e+00> : vector<8x32xf32>
    %129 = tpu.matmul %127, %128, %cst_62 {dimension_numbers = #tpu.dot_dimension_numbers<[1], [0], [0], [1], [0, 0, 1, 1], [], []>} : vector<8x128xf32>, vector<128x32xf32>, vector<8x32xf32> -> vector<8x32xf32>
    %c0_63 = arith.constant 0 : index
    %c0_64 = arith.constant 0 : index
    %130 = vector.load %arg16[%c0_63, %c0_64] : memref<1x32xf32, #tpu.memory_space<vmem>>, vector<1x32xf32>
    %131 = vector.broadcast %124 : vector<8x1xf32> to vector<8x32xf32>
    %132 = arith.subf %129, %131 : vector<8x32xf32>
    %133 = vector.broadcast %130 : vector<1x32xf32> to vector<8x32xf32>
    %134 = arith.mulf %133, %132 : vector<8x32xf32>
    %c0_65 = arith.constant 0 : index
    %c0_66 = arith.constant 0 : index
    %135 = vector.load %arg17[%c0_65, %c0_66] : memref<1x32xf32, #tpu.memory_space<vmem>>, vector<1x32xf32>
    %136 = vector.broadcast %135 : vector<1x32xf32> to vector<8x32xf32>
    %137 = arith.addf %134, %136 : vector<8x32xf32>
    %138 = tpu.concatenate %137, %71 in 1 : vector<8x32xf32>, vector<8x4xf32> -> vector<8x36xf32>
    %c0_67 = arith.constant 0 : index
    %c0_68 = arith.constant 0 : index
    %139 = vector.load %arg21[%c0_67, %c0_68] : memref<8x36xf32, #tpu.memory_space<vmem>>, vector<8x36xf32>
    tpu.vector_store %arg21[%c0_67, %c0_68], %138 {strides = array<i32>} : memref<8x36xf32, #tpu.memory_space<vmem>>, vector<8x36xf32>,
    return
  }
  func.func @transform_0(%arg0: i32) -> (i32, i32) {
    %c0_i32 = arith.constant 0 : i32
    %c0_i32_0 = arith.constant 0 : i32
    return %arg0, %c0_i32 : i32, i32
  }
  func.func @transform_1(%arg0: i32) -> (i32, i32) {
    %c0_i32 = arith.constant 0 : i32
    %c0_i32_0 = arith.constant 0 : i32
    %c0_i32_1 = arith.constant 0 : i32
    return %c0_i32, %c0_i32_0 : i32, i32
  }
  func.func @transform_2(%arg0: i32) -> (i32, i32) {
    %c0_i32 = arith.constant 0 : i32
    %c0_i32_0 = arith.constant 0 : i32
    %c0_i32_1 = arith.constant 0 : i32
    return %c0_i32, %c0_i32_0 : i32, i32
  }
  func.func @transform_3(%arg0: i32) -> (i32, i32) {
    %c0_i32 = arith.constant 0 : i32
    %c0_i32_0 = arith.constant 0 : i32
    %c0_i32_1 = arith.constant 0 : i32
    return %c0_i32, %c0_i32_0 : i32, i32
  }
  func.func @transform_4(%arg0: i32) -> (i32, i32) {
    %c0_i32 = arith.constant 0 : i32
    %c0_i32_0 = arith.constant 0 : i32
    %c0_i32_1 = arith.constant 0 : i32
    return %c0_i32, %c0_i32_0 : i32, i32
  }
  func.func @transform_5(%arg0: i32) -> (i32, i32) {
    %c0_i32 = arith.constant 0 : i32
    %c0_i32_0 = arith.constant 0 : i32
    %c0_i32_1 = arith.constant 0 : i32
    return %c0_i32, %c0_i32_0 : i32, i32
  }
  func.func @transform_6(%arg0: i32) -> (i32, i32) {
    %c0_i32 = arith.constant 0 : i32
    %c0_i32_0 = arith.constant 0 : i32
    %c0_i32_1 = arith.constant 0 : i32
    return %c0_i32, %c0_i32_0 : i32, i32
  }
  func.func @transform_7(%arg0: i32) -> (i32, i32) {
    %c0_i32 = arith.constant 0 : i32
    %c0_i32_0 = arith.constant 0 : i32
    %c0_i32_1 = arith.constant 0 : i32
    return %c0_i32, %c0_i32_0 : i32, i32
  }
  func.func @transform_8(%arg0: i32) -> (i32, i32) {
    %c0_i32 = arith.constant 0 : i32
    %c0_i32_0 = arith.constant 0 : i32
    %c0_i32_1 = arith.constant 0 : i32
    return %c0_i32, %c0_i32_0 : i32, i32
  }
  func.func @transform_9(%arg0: i32) -> (i32, i32) {
    %c0_i32 = arith.constant 0 : i32
    %c0_i32_0 = arith.constant 0 : i32
    %c0_i32_1 = arith.constant 0 : i32
    return %c0_i32, %c0_i32_0 : i32, i32
  }
  func.func @transform_10(%arg0: i32) -> (i32, i32) {
    %c0_i32 = arith.constant 0 : i32
    %c0_i32_0 = arith.constant 0 : i32
    %c0_i32_1 = arith.constant 0 : i32
    return %c0_i32, %c0_i32_0 : i32, i32
  }
  func.func @transform_11(%arg0: i32) -> (i32, i32) {
    %c0_i32 = arith.constant 0 : i32
    %c0_i32_0 = arith.constant 0 : i32
    %c0_i32_1 = arith.constant 0 : i32
    return %c0_i32, %c0_i32_0 : i32, i32
  }
  func.func @transform_12(%arg0: i32) -> (i32, i32) {
    %c0_i32 = arith.constant 0 : i32
    %c0_i32_0 = arith.constant 0 : i32
    %c0_i32_1 = arith.constant 0 : i32
    return %c0_i32, %c0_i32_0 : i32, i32
  }
  func.func @transform_13(%arg0: i32) -> (i32, i32) {
    %c0_i32 = arith.constant 0 : i32
    %c0_i32_0 = arith.constant 0 : i32
    %c0_i32_1 = arith.constant 0 : i32
    return %c0_i32, %c0_i32_0 : i32, i32
  }
  func.func @transform_14(%arg0: i32) -> (i32, i32) {
    %c0_i32 = arith.constant 0 : i32
    %c0_i32_0 = arith.constant 0 : i32
    %c0_i32_1 = arith.constant 0 : i32
    return %c0_i32, %c0_i32_0 : i32, i32
  }
  func.func @transform_15(%arg0: i32) -> (i32, i32) {
    %c0_i32 = arith.constant 0 : i32
    %c0_i32_0 = arith.constant 0 : i32
    %c0_i32_1 = arith.constant 0 : i32
    return %c0_i32, %c0_i32_0 : i32, i32
  }
  func.func @transform_16(%arg0: i32) -> (i32, i32) {
    %c0_i32 = arith.constant 0 : i32
    %c0_i32_0 = arith.constant 0 : i32
    %c0_i32_1 = arith.constant 0 : i32
    return %c0_i32, %c0_i32_0 : i32, i32
  }
  func.func @transform_17(%arg0: i32) -> (i32, i32) {
    %c0_i32 = arith.constant 0 : i32
    %c0_i32_0 = arith.constant 0 : i32
    %c0_i32_1 = arith.constant 0 : i32
    return %c0_i32, %c0_i32_0 : i32, i32
  }
  func.func @transform_18(%arg0: i32) -> (i32, i32) {
    %c0_i32 = arith.constant 0 : i32
    %c0_i32_0 = arith.constant 0 : i32
    %c0_i32_1 = arith.constant 0 : i32
    return %c0_i32, %c0_i32_0 : i32, i32
  }
  func.func @transform_19(%arg0: i32) -> (i32, i32) {
    %c0_i32 = arith.constant 0 : i32
    %c0_i32_0 = arith.constant 0 : i32
    %c0_i32_1 = arith.constant 0 : i32
    return %c0_i32, %c0_i32_0 : i32, i32
  }
  func.func @transform_20(%arg0: i32) -> (i32, i32) {
    %c0_i32 = arith.constant 0 : i32
    %c0_i32_0 = arith.constant 0 : i32
    return %arg0, %c0_i32 : i32, i32
  }
}

</mosaic_0001>

<bundles_post_ra>
// kernel: tpu_custom_call.1
= control target key start
LH: loop header
LB: loop body
LE: loop exit
PB: predicated region body
PF: predicated region fallthrough
CT: control target
= control target key end

     0   :  { %s1803_s0 = inlined_call_operand.vmem [shape: f32[8,128], index: 0, kind: input, shape index: {}]   ;;  %s1804_s1 = inlined_call_operand.vmem [shape: f32[128,256], index: 1, kind: input, shape index: {}]   ;;  %s1805_s2 = inlined_call_operand.vmem [shape: f32[1,256], index: 2, kind: input, shape index: {}]   ;;  %s1806_s3 = inlined_call_operand.vmem [shape: f32[32,32], index: 3, kind: input, shape index: {}]   ;;  %s1807_s4 = inlined_call_operand.vmem [shape: f32[1,32], index: 4, kind: input, shape index: {}]   ;;  %s1808_s5 = inlined_call_operand.vmem [shape: f32[32,256], index: 5, kind: input, shape index: {}]   ;;  %s1809_s6 = inlined_call_operand.vmem [shape: f32[1,256], index: 6, kind: input, shape index: {}]   ;;  %s1810_s7 = inlined_call_operand.vmem [shape: f32[1,4], index: 7, kind: input, shape index: {}]   ;;  %s1811_s8 = inlined_call_operand.vmem [shape: f32[1,4], index: 8, kind: input, shape index: {}]   ;;  %s1812_s9 = inlined_call_operand.vmem [shape: bf16[128,128], index: 9, kind: input, shape index: {}]   ;;  %s1813_s10 = inlined_call_operand.vmem [shape: f32[1,128], index: 10, kind: input, shape index: {}]   ;;  %s1814_s11 = inlined_call_operand.vmem [shape: bf16[128,128], index: 11, kind: input, shape index: {}]   ;;  %s1815_s12 = inlined_call_operand.vmem [shape: f32[1,128], index: 12, kind: input, shape index: {}]   ;;  %s1816_s13 = inlined_call_operand.vmem [shape: bf16[128,256], index: 13, kind: input, shape index: {}]   ;;  %s1817_s14 = inlined_call_operand.vmem [shape: f32[1,256], index: 14, kind: input, shape index: {}]   ;;  %s1818_s15 = inlined_call_operand.vmem [shape: f32[1,32], index: 15, kind: input, shape index: {}]   ;;  %s1819_s16 = inlined_call_operand.vmem [shape: f32[1,32], index: 16, kind: input, shape index: {}]   ;;  %s1820_s17 = inlined_call_operand.vmem [shape: f32[256,132], index: 17, kind: input, shape index: {}]   ;;  %s1821_s18 = inlined_call_operand.vmem [shape: f32[4,128], index: 18, kind: input, shape index: {}]   ;;  %s1822_s19 = inlined_call_operand.vmem [shape: f32[128,32], index: 19, kind: input, shape index: {}]   ;;  %s1823_s20 = inlined_call_operand.hbm [shape: f32[8,36], index: 20, kind: output, shape index: {}]  }
   0x1   :  { %1826 = sst [smem:[#allocation5_spill]] %s1803_s0 }
   0x2   :  { %1827 = sst [smem:[#allocation6_spill]] %s1804_s1 }
   0x3   :  { %1828 = sst [smem:[#allocation7_spill]] %s1805_s2 }
   0x4   :  { %1829 = sst [smem:[#allocation8_spill]] %s1806_s3 }
   0x5   :  { %1830 = sst [smem:[#allocation9_spill]] %s1807_s4 }
   0x6   :  { %s1831_s23 = sld [smem:[#allocation6_spill]] }
   0xc   :  { %v97_v0 = vld [vmem:[%s1831_s23 + $0xf0] sm:$0xff]  ;;  %v95_v1 = vld [vmem:[%s1831_s23 + $0xe0] sm:$0xff] }
   0xd   :  { %105 = vmatpush.msra.mxu0 %v97_v0  ;;  %v93_v2 = vld [vmem:[%s1831_s23 + $0xd0] sm:$0xff]  ;;  %v91_v3 = vld [vmem:[%s1831_s23 + $0xc0] sm:$0xff] }
   0xe   :  { %v89_v4 = vld [vmem:[%s1831_s23 + $0xb0] sm:$0xff]  ;;  %v87_v5 = vld [vmem:[%s1831_s23 + $0xa0] sm:$0xff] }
   0xf   :  { %106 = vmatpush.msra.mxu0 %v95_v1 }
  0x11   :  { %107 = vmatpush.msra.mxu0 %v93_v2 }
  0x13   :  { %108 = vmatpush.msra.mxu0 %v91_v3 }
  0x14   :  { %25 = vsyncpa [#allocation3], 0  ;;  %v85_v6 = vld [vmem:[%s1831_s23 + $0x90] sm:$0xff]  ;;  %v83_v7 = vld [vmem:[%s1831_s23 + $0x80] sm:$0xff]  ;;  %s1832_s26 = sld [smem:[#allocation5_spill]]  ;;  %vm159_vm0 = vcmask 261120  }
  0x15   :  { %109 = vmatpush.msra.mxu0 %v89_v4  ;;  %v81_v8 = vld [vmem:[%s1831_s23 + $0x70] sm:$0xff]  ;;  %v79_v9 = vld [vmem:[%s1831_s23 + $0x60] sm:$0xff]  ;;  %s1833_s4 = sld [smem:[#allocation8_spill]]  ;;  %v190_v33 = vld [vmem:[%s1808_s5 + $0x38] sm:$0xff]  ;;  %vm247_vm2 = vcmask 31744   ;;  %vm772_vm8 = vcmask 1043456  }
  0x16   :  { %v77_v10 = vld [vmem:[%s1831_s23 + $0x50] sm:$0xff]  ;;  %v75_v11 = vld [vmem:[%s1831_s23 + $0x40] sm:$0xff]  ;;  %s1834_s0 = sld [smem:[#allocation7_spill]]  ;;  %v188_v35 = vld [vmem:[%s1808_s5 + $0x28] sm:$0xff]  ;;  %s1093_s28 = smov 32   ;;  %vm849_vm12 = vcmask 293888  }
  0x17   :  { %110 = vmatpush.msra.mxu0 %v87_v5  ;;  %v73_v12 = vld [vmem:[%s1831_s23 + $0x30] sm:$0xff]  ;;  %v71_v13 = vld [vmem:[%s1831_s23 + $0x20] sm:$0xff]  ;;  %v186_v36 = vld [vmem:[%s1808_s5 + $0x18] sm:$0xff]  ;;  %s1835_s2 = sld [smem:[#allocation9_spill]]  ;;  %s1094_s3 = smov [#allocation2]  }
  0x18   :  { %v69_v14 = vld [vmem:[%s1831_s23 + $0x10] sm:$0xff]  ;;  %v67_v15 = vld [vmem:[%s1831_s23] sm:$0xff]  ;;  %v184_v37 = vld [vmem:[%s1808_s5 + $0x8] sm:$0xff] }
  0x19   :  { %111 = vmatpush.msra.mxu0 %v85_v6  ;;  %v189_v21 = vld [vmem:[%s1808_s5 + $0x30] sm:$0xff]  ;;  %v187_v22 = vld [vmem:[%s1808_s5 + $0x20] sm:$0xff]  ;;  %v98_v38 = vld [vmem:[%s1831_s23 + $0xf8] sm:$0xff] }
  0x1a   :  { %v1251_v16 = vld [vmem:[%s1832_s26] sm:$0xff]  ;;  %v185_v23 = vld [vmem:[%s1808_s5 + $0x10] sm:$0xff]  ;;  %v96_v39 = vld [vmem:[%s1831_s23 + $0xe8] sm:$0xff]  ;;  %125 = vmatpush.msra.mxu1 %v98_v38  ;;  %s858_s26 = sshll.u32 %s1823_s20, 4  ;;  %s859_s26 = int_to_ptr.hbm [resolvable:$true] %s858_s26 }
  0x1b   :  { %112 = vmatpush.msra.mxu0 %v83_v7  ;;  %v154_v17 = vld [vmem:[%s1833_s4 + $0x18] sm:$0xff]  ;;  %v153_v18 = vld [vmem:[%s1833_s4 + $0x10] sm:$0xff]  ;;  %v152_v19 = vld [vmem:[%s1833_s4 + $0x8] sm:$0xff]  ;;  %v298_v1 = vpack.c.bf16 %v1251_v16, %v1251_v16 }
  0x1c   :  { %175 = vmatpush.msra.mxu3 %v154_v17  ;;  %v151_v20 = vld [vmem:[%s1833_s4] sm:$0xff]  ;;  %126 = vmatpush.msra.mxu1 %v96_v39  ;;  %v94_v40 = vld [vmem:[%s1831_s23 + $0xd8] sm:$0xff]  ;;  %v92_v41 = vld [vmem:[%s1831_s23 + $0xc8] sm:$0xff] }
  0x1d   :  { %113 = vmatpush.msra.mxu0 %v81_v8  ;;  %v183_v24 = vld [vmem:[%s1808_s5] sm:$0xff]  ;;  %v90_v42 = vld [vmem:[%s1831_s23 + $0xb8] sm:$0xff]  ;;  %v88_v43 = vld [vmem:[%s1831_s23 + $0xa8] sm:$0xff] }
  0x1e   :  { %176 = vmatpush.msra.mxu3 %v153_v18  ;;  %v1281_v25 = vld [vmem:[%s1834_s0] sm:$0x3]  ;;  %127 = vmatpush.msra.mxu1 %v94_v40  ;;  %v86_v44 = vld [vmem:[%s1831_s23 + $0x98] sm:$0xff]  ;;  %v84_v45 = vld [vmem:[%s1831_s23 + $0x88] sm:$0xff] }
  0x1f   :  { %114 = vmatpush.msra.mxu0 %v79_v9  ;;  %v101_v26 = vperm.slane %v1281_v25, 0  ;;  %v82_v46 = vld [vmem:[%s1831_s23 + $0x78] sm:$0xff]  ;;  %v80_v47 = vld [vmem:[%s1831_s23 + $0x68] sm:$0xff]  ;;  %v1037_v50 = vld [vmem:[%s1835_s2] ss:$0 sm:$0xff] }
  0x20   :  { %177 = vmatpush.msra.mxu3 %v152_v19  ;;  %128 = vmatpush.msra.mxu1 %v92_v41  ;;  %v78_v48 = vld [vmem:[%s1831_s23 + $0x58] sm:$0xff]  ;;  %v76_v49 = vld [vmem:[%s1831_s23 + $0x48] sm:$0xff]  ;;  %v1008_v57 = vld [vmem:[%s1812_s9 + $0x30] sm:$0xff] }
  0x21   :  { %115 = vmatpush.msra.mxu0 %v77_v10  ;;  %v1009_v52 = vld [vmem:[%s1812_s9 + $0x38] sm:$0xff]  ;;  %v72_v54 = vld [vmem:[%s1831_s23 + $0x28] sm:$0xff]  ;;  %v1006_v60 = vld [vmem:[%s1812_s9 + $0x20] sm:$0xff] }
  0x22   :  { %178 = vmatpush.msra.mxu3 %v151_v20  ;;  %129 = vmatpush.msra.mxu1 %v90_v42  ;;  %v74_v53 = vld [vmem:[%s1831_s23 + $0x38] sm:$0xff]  ;;  %v68_v58 = vld [vmem:[%s1831_s23 + $0x8] sm:$0xff]  ;;  %v1004_v62 = vld [vmem:[%s1812_s9 + $0x10] sm:$0xff] }
  0x23   :  { %116 = vmatpush.msra.mxu0 %v75_v11  ;;  %v70_v56 = vld [vmem:[%s1831_s23 + $0x18] sm:$0xff]  ;;  %v1007_v59 = vld [vmem:[%s1812_s9 + $0x28] sm:$0xff]  ;;  %v1002_v0 = vld [vmem:[%s1812_s9] sm:$0xff] }
  0x24   :  { %212 = vmatpush.msrb.mxu3 %v189_v21  ;;  %130 = vmatpush.msra.mxu1 %v88_v43  ;;  %v1005_v61 = vld [vmem:[%s1812_s9 + $0x18] sm:$0xff]  ;;  %v1003_v63 = vld [vmem:[%s1812_s9 + $0x8] sm:$0xff]  ;;  %v1016_v3 = vld [vmem:[%s1814_s11 + $0x30] sm:$0xff]  ;;  %v102_v21 = vperm.slane %v1281_v25, 1 }
  0x25   :  { %117 = vmatpush.msra.mxu0 %v73_v12  ;;  %v1017_v2 = vld [vmem:[%s1814_s11 + $0x38] sm:$0xff]  ;;  %v1015_v4 = vld [vmem:[%s1814_s11 + $0x28] sm:$0xff]  ;;  %v1014_v5 = vld [vmem:[%s1814_s11 + $0x20] sm:$0xff] }
  0x26   :  { %213 = vmatpush.msrb.mxu3 %v187_v22  ;;  %131 = vmatpush.msra.mxu1 %v86_v44  ;;  %v1013_v7 = vld [vmem:[%s1814_s11 + $0x18] sm:$0xff]  ;;  %v191_v8 = vld [vmem:[%s1809_s6] sm:$0x3]  ;;  %v1012_v10 = vld [vmem:[%s1814_s11 + $0x10] sm:$0xff]  ;;  %v1092_v44 = vmov 4.0  }
  0x27   :  { %118 = vmatpush.msra.mxu0 %v71_v13  ;;  %455 = vmatpush.bf16.msra.mxu2 %v1017_v2  ;;  %v194_v9 = vperm.slane %v191_v8, 1  ;;  %v1011_v12 = vld [vmem:[%s1814_s11 + $0x8] sm:$0xff]  ;;  %v193_v20 = vperm.slane %v191_v8, 0  ;;  %v1032_v39 = vld [vmem:[%s1816_s13 + $0x74] sm:$0xf] }
  0x28   :  { %214 = vmatpush.msrb.mxu3 %v185_v23  ;;  %132 = vmatpush.msra.mxu1 %v84_v45  ;;  %v996_v40 = vld [vmem:[%s1816_s13 + $0x78] sm:$0xf0]  ;;  %v1030_v42 = vld [vmem:[%s1816_s13 + $0x64] sm:$0xf]  ;;  %v988_v43 = vld [vmem:[%s1816_s13 + $0x68] sm:$0xf0] }
  0x29   :  { %119 = vmatpush.msra.mxu0 %v69_v14  ;;  %v999_v41 = vor.u32 %v1032_v39, %v996_v40  ;;  %v991_v45 = vor.u32 %v1030_v42, %v988_v43  ;;  %v667_v42 = vld [vmem:[%s1820_s17 + $0x1f0] sm:$0xff] }
  0x2a   :  { %215 = vmatpush.msrb.mxu3 %v183_v24  ;;  %133 = vmatpush.msra.mxu1 %v82_v46  ;;  %v1028_v46 = vld [vmem:[%s1816_s13 + $0x54] sm:$0xf] }
  0x2b   :  { %120 = vmatpush.msra.mxu0 %v67_v15  ;;  %456 = vmatpush.bf16.msra.mxu2 %v1016_v3  ;;  %v1010_v15 = vld [vmem:[%s1814_s11] sm:$0xff] }
  0x2c   :  { %121 = vmatmul.f32.vlgmr.msra.gmra.mxu0 %v1251_v16  ;;  %134 = vmatpush.msra.mxu1 %v80_v47  ;;  %v980_v47 = vld [vmem:[%s1816_s13 + $0x58] sm:$0xf0] }
  0x2e   :  { %135 = vmatpush.msra.mxu1 %v78_v48  ;;  %v983_v48 = vor.u32 %v1028_v46, %v980_v47  ;;  %v633_v46 = vld [vmem:[%s1820_s17 + $0xe0] sm:$0xff] }
  0x2f   :  { %457 = vmatpush.bf16.msra.mxu2 %v1015_v4  ;;  %v1020_v4 = vld [vmem:[%s1816_s13 + $0x14] sm:$0xf]  ;;  %v665_v47 = vld [vmem:[%s1820_s17 + $0x1e0] sm:$0xff] }
  0x30   :  { %136 = vmatpush.msra.mxu1 %v76_v49  ;;  %v1026_v49 = vld [vmem:[%s1816_s13 + $0x44] sm:$0xf] }
  0x32   :  { %137 = vmatpush.msra.mxu1 %v74_v53 }
  0x33   :  { %458 = vmatpush.bf16.msra.mxu2 %v1014_v5  ;;  %v948_v5 = vld [vmem:[%s1816_s13 + $0x18] sm:$0xf0] }
  0x34   :  { %138 = vmatpush.msra.mxu1 %v72_v54 }
  0x36   :  { %139 = vmatpush.msra.mxu1 %v70_v56  ;;  %v1031_v56 = vld [vmem:[%s1816_s13 + $0x64] sm:$0xf0] }
  0x37   :  { %459 = vmatpush.bf16.msra.mxu2 %v1013_v7 }
  0x38   :  { %140 = vmatpush.msra.mxu1 %v68_v58 }
  0x39   :  { %141 = vmatmul.f32.vlgmr.msra.gmra.mxu1 %v1251_v16 }
  0x3a   :  { %584 = vmatpush.bf16.msrb.mxu1 %v999_v41  ;;  %v635_v41 = vld [vmem:[%s1820_s17 + $0xf0] sm:$0xff] }
  0x3b   :  { %460 = vmatpush.bf16.msra.mxu2 %v1012_v10  ;;  %v1029_v10 = vld [vmem:[%s1816_s13 + $0x54] sm:$0xf0] }
  0x3e   :  { %585 = vmatpush.bf16.msrb.mxu1 %v991_v45 }
  0x3f   :  { %461 = vmatpush.bf16.msra.mxu2 %v1011_v12 }
  0x42   :  { %586 = vmatpush.bf16.msrb.mxu1 %v983_v48  ;;  %v631_v48 = vld [vmem:[%s1820_s17 + $0xd0] sm:$0xff] }
  0x43   :  { %462 = vmatpush.bf16.msra.mxu2 %v1010_v15 }
  0x47   :  { %689 = vmatpush.msrb.mxu2 %v667_v42  ;;  %v485_v42 = vld [vmem:[%s1817_s14] sm:$0x3] }
  0x49   :  { %690 = vmatpush.msrb.mxu2 %v665_v47  ;;  %v648_v47 = vld [vmem:[%s1820_s17 + $0x158] sm:$0xff] }
  0xa9   :  { %v122_v27 = vpop.f32.mrf.mxu0 }
  0xaa   :  { %v123_v28 = vadd.f32 %v122_v27, %v101_v26  ;;  %v1038_v26 = vld [vmem:[%s1813_s10] ss:$0 sm:$0xff] }
  0xac   :  { %v146_v29 = vmin.f32 %v123_v28, 0.0  ;;  %vm145_vm1 = vcmp.gt.f32.partialorder %v123_v28, 0.0 }
  0xae   :  { %v147_v30 = vmul.f32 1.442695, %v146_v29 }
  0xb0   :  { %1044 = vpow2.f32 %v147_v30 }
  0xb6   :  { %v1045_v31 = vpop.eup %1044  ;;  %v142_v22 = vpop.f32.mrf.mxu1 }
  0xb7   :  { %v867_v32 = vadd.f32 -1.0, %v1045_v31  ;;  %v143_v24 = vadd.f32 %v142_v22, %v102_v21  ;;  %v962_v22 = vld [vmem:[%s1816_s13 + $0x30] sm:$0xf] }
  0xb9   :  { %v150_v34 = vsel %vm145_vm1, %v123_v28, %v867_v32 }
  0xba   :  { %868 = vmatmul.msk.f32.vlgmr.msra.gmra.mxu3 %vm159_vm0, %v150_v34 }
  0xbb   :  { %232 = vmatpush.msra.mxu3 %v190_v33 }
  0xbd   :  { %233 = vmatpush.msra.mxu3 %v188_v35 }
  0xbf   :  { %234 = vmatpush.msra.mxu3 %v186_v36 }
  0xc1   :  { %235 = vmatpush.msra.mxu3 %v184_v37 }
 0x13d   :  { %v180_v51 = vpop.f32.mrf.mxu3 }
 0x13e   :  { %v181_v55 = vadd.f32 %v1037_v50, %v180_v51  ;;  %v972_v50 = vld [vmem:[%s1816_s13 + $0x48] sm:$0xf0]  ;;  %v994_v51 = vld [vmem:[%s1816_s13 + $0x70] sm:$0xf] }
 0x140   :  { %869 = vmatmul.msk.f32.vlgmr.msrb.gmra.mxu3 %vm159_vm0, %v181_v55 }
 0x141   :  { %367 = vmatpush.bf16.msrb.mxu3 %v1009_v52  ;;  %v1033_v52 = vld [vmem:[%s1816_s13 + $0x74] sm:$0xf0] }
 0x142   :  { %v995_v54 = vor.u32 %v1033_v52, %v994_v51  ;;  %v661_v51 = vld [vmem:[%s1820_s17 + $0x1c0] sm:$0xff] }
 0x144   :  { %571 = vmatpush.bf16.msrb.mxu0 %v995_v54  ;;  %v659_v54 = vld [vmem:[%s1820_s17 + $0x1b0] sm:$0xff] }
 0x145   :  { %368 = vmatpush.bf16.msrb.mxu3 %v1008_v57  ;;  %v975_v57 = vor.u32 %v1026_v49, %v972_v50  ;;  %v663_v49 = vld [vmem:[%s1820_s17 + $0x1d0] sm:$0xff]  ;;  %v629_v50 = vld [vmem:[%s1820_s17 + $0xc0] sm:$0xff] }
 0x146   :  { %691 = vmatpush.msrb.mxu2 %v663_v49  ;;  %v637_v49 = vld [vmem:[%s1820_s17 + $0x100] sm:$0xff] }
 0x147   :  { %587 = vmatpush.bf16.msrb.mxu1 %v975_v57  ;;  %v668_v57 = vld [vmem:[%s1820_s17 + $0x1f8] sm:$0xff] }
 0x148   :  { %870 = vmatmul.msk.f32.vlgmr.msra.gmra.mxu3 %vm159_vm0, %v181_v55  ;;  %v986_v55 = vld [vmem:[%s1816_s13 + $0x60] sm:$0xf]  ;;  %692 = vmatpush.msrb.mxu2 %v661_v51  ;;  %v646_v51 = vld [vmem:[%s1820_s17 + $0x148] sm:$0xff] }
 0x149   :  { %369 = vmatpush.bf16.msrb.mxu3 %v1007_v59  ;;  %v987_v58 = vor.u32 %v1031_v56, %v986_v55  ;;  %v636_v55 = vld [vmem:[%s1820_s17 + $0xf8] sm:$0xff] }
 0x14a   :  { %693 = vmatpush.msrb.mxu2 %v659_v54  ;;  %v644_v54 = vld [vmem:[%s1820_s17 + $0x138] sm:$0xff] }
 0x14b   :  { %572 = vmatpush.bf16.msrb.mxu0 %v987_v58  ;;  %v625_v58 = vld [vmem:[%s1820_s17 + $0xa0] sm:$0xff] }
 0x14d   :  { %370 = vmatpush.bf16.msrb.mxu3 %v1006_v60  ;;  %v1024_v60 = vld [vmem:[%s1816_s13 + $0x34] sm:$0xf] }
 0x151   :  { %371 = vmatpush.bf16.msrb.mxu3 %v1005_v61  ;;  %v964_v61 = vld [vmem:[%s1816_s13 + $0x38] sm:$0xf0] }
 0x155   :  { %372 = vmatpush.bf16.msrb.mxu3 %v1004_v62  ;;  %v967_v62 = vor.u32 %v1024_v60, %v964_v61  ;;  %v634_v61 = vld [vmem:[%s1820_s17 + $0xe8] sm:$0xff] }
 0x157   :  { %588 = vmatpush.bf16.msrb.mxu1 %v967_v62  ;;  %v666_v62 = vld [vmem:[%s1820_s17 + $0x1e8] sm:$0xff] }
 0x159   :  { %373 = vmatpush.bf16.msrb.mxu3 %v1003_v63 }
 0x15d   :  { %374 = vmatpush.bf16.msrb.mxu3 %v1002_v0  ;;  %v1022_v0 = vld [vmem:[%s1816_s13 + $0x24] sm:$0xf] }
 0x160   :  { %375 = vmatmul.bf16.vlgmr.msrb.gmra.mxu3 %v298_v1  ;;  %v956_v1 = vld [vmem:[%s1816_s13 + $0x28] sm:$0xf0] }
 0x161   :  { %v959_v2 = vor.u32 %v1022_v0, %v956_v1  ;;  %669 = vmatpush.msra.mxu3 %v635_v41  ;;  %v655_v0 = vld [vmem:[%s1820_s17 + $0x190] sm:$0xff]  ;;  %v632_v1 = vld [vmem:[%s1820_s17 + $0xd8] sm:$0xff]  ;;  %v618_v41 = vld [vmem:[%s1820_s17 + $0x68] sm:$0xff] }
 0x163   :  { %589 = vmatpush.bf16.msrb.mxu1 %v959_v2  ;;  %670 = vmatpush.msra.mxu3 %v633_v46  ;;  %v616_v46 = vld [vmem:[%s1820_s17 + $0x58] sm:$0xff] }
 0x165   :  { %671 = vmatpush.msra.mxu3 %v631_v48  ;;  %v605_v48 = vld [vmem:[%s1820_s17] sm:$0xff] }
 0x167   :  { %672 = vmatpush.msra.mxu3 %v629_v50  ;;  %v614_v50 = vld [vmem:[%s1820_s17 + $0x48] sm:$0xff] }
 0x1c3   :  { %v217_v6 = vpop.f32.mrf.mxu3 }
 0x1c4   :  { %v218_v23 = vadd.f32 %v217_v6, %v193_v20  ;;  %v951_v6 = vor.u32 %v1020_v4, %v948_v5  ;;  %v621_v4 = vld [vmem:[%s1820_s17 + $0x80] sm:$0xff] }
 0x1c5   :  { %v653_v5 = vld [vmem:[%s1820_s17 + $0x180] sm:$0xff] }
 0x1c6   :  { %590 = vmatpush.bf16.msrb.mxu1 %v951_v6  ;;  %v630_v6 = vld [vmem:[%s1820_s17 + $0xc8] sm:$0xff] }
 0x1cb   :  { %v237_v11 = vpop.f32.mrf.mxu3 }
 0x1cc   :  { %v238_v13 = vadd.f32 %v237_v11, %v194_v9  ;;  %v978_v9 = vld [vmem:[%s1816_s13 + $0x50] sm:$0xf]  ;;  %v1018_v11 = vld [vmem:[%s1816_s13 + $0x4] sm:$0xf] }
 0x1cd   :  { %v979_v12 = vor.u32 %v1029_v10, %v978_v9  ;;  %v619_v9 = vld [vmem:[%s1820_s17 + $0x70] sm:$0xff] }
 0x1ce   :  { %v240_v14 = vsub.f32 0.0, %v238_v13  ;;  %v940_v13 = vld [vmem:[%s1816_s13 + $0x8] sm:$0xf0]  ;;  %v651_v10 = vld [vmem:[%s1820_s17 + $0x170] sm:$0xff] }
 0x1cf   :  { %v943_v15 = vor.u32 %v1018_v11, %v940_v13  ;;  %573 = vmatpush.bf16.msrb.mxu0 %v979_v12  ;;  %v628_v11 = vld [vmem:[%s1820_s17 + $0xb8] sm:$0xff] }
 0x1d0   :  { %v241_v17 = vmul.f32 1.442695, %v240_v14 }
 0x1d1   :  { %591 = vmatpush.bf16.msrb.mxu1 %v943_v15  ;;  %v660_v15 = vld [vmem:[%s1820_s17 + $0x1b8] sm:$0xff] }
 0x1d2   :  { %1046 = vpow2.f32 %v241_v17 }
 0x1d5   :  { %729 = vmatpush.msra.mxu1 %v668_v57 }
 0x1d7   :  { %730 = vmatpush.msra.mxu1 %v666_v62  ;;  %v606_v62 = vld [vmem:[%s1820_s17 + $0x8] sm:$0xff] }
 0x1d8   :  { %v1047_v18 = vpop.eup %1046 }
 0x1d9   :  { %v243_v19 = vadd.f32 1.0, %v1047_v18  ;;  %v970_v18 = vld [vmem:[%s1816_s13 + $0x40] sm:$0xf] }
 0x1db   :  { %1048 = vrcp.f32 %v243_v19  ;;  %v1027_v19 = vld [vmem:[%s1816_s13 + $0x44] sm:$0xf0] }
 0x1dc   :  { %v971_v21 = vor.u32 %v1027_v19, %v970_v18  ;;  %v649_v18 = vld [vmem:[%s1820_s17 + $0x160] sm:$0xff]  ;;  %v626_v19 = vld [vmem:[%s1820_s17 + $0xa8] sm:$0xff] }
 0x1de   :  { %574 = vmatpush.bf16.msrb.mxu0 %v971_v21 }
 0x1e1   :  { %v1049_v27 = vpop.eup %1048 }
 0x1e2   :  { %v245_v28 = vmul.f32 %v1049_v27, %v218_v23  ;;  %v1025_v23 = vld [vmem:[%s1816_s13 + $0x34] sm:$0xf0]  ;;  %v954_v27 = vld [vmem:[%s1816_s13 + $0x20] sm:$0xf] }
 0x1e3   :  { %v376_v29 = vpop.f32.mrf.mxu3 }
 0x1e4   :  { %v377_v30 = vadd.f32 %v1038_v26, %v376_v29  ;;  %v1408_v31 = vadd.f32 %v245_v28, %v143_v24  ;;  %v963_v26 = vor.u32 %v1025_v23, %v962_v22  ;;  %v1023_v28 = vld [vmem:[%s1816_s13 + $0x24] sm:$0xf0]  ;;  %v615_v23 = vld [vmem:[%s1820_s17 + $0x50] sm:$0xff] }
 0x1e5   :  { %v658_v22 = vld [vmem:[%s1820_s17 + $0x1a8] sm:$0xff] }
 0x1e6   :  { %v381_v32 = vmin.f32 %v377_v30, 0.0  ;;  %v248_v33 = vsel %vm247_vm2, %v1408_v31, 0.0  ;;  %vm380_vm3 = vcmp.gt.f32.partialorder %v377_v30, 0.0  ;;  %575 = vmatpush.bf16.msrb.mxu0 %v963_v26 }
 0x1e7   :  { %249 = vadd.xlane.f32.xlu0 %v248_v33 }
 0x1e8   :  { %v382_v25 = vmul.f32 1.442695, %v381_v32  ;;  %v1021_v32 = vld [vmem:[%s1816_s13 + $0x14] sm:$0xf0] }
 0x1ea   :  { %1050 = vpow2.f32 %v382_v25  ;;  %v938_v25 = vld [vmem:[%s1816_s13] sm:$0xf] }
 0x1eb   :  { %v378_v34 = vpop.f32.mrf.mxu3  ;;  %1052 = vrcp.f32 %v1092_v44 }
 0x1ec   :  { %v1019_v34 = vld [vmem:[%s1816_s13 + $0x4] sm:$0xf0] }
 0x1f0   :  { %v1051_v35 = vpop.eup %1050 }
 0x1f1   :  { %v903_v36 = vadd.f32 -1.0, %v1051_v35  ;;  %v1053_v53 = vpop.eup %1052  ;;  %v939_v35 = vor.u32 %v1019_v34, %v938_v25  ;;  %v611_v34 = vld [vmem:[%s1820_s17 + $0x30] sm:$0xff] }
 0x1f2   :  { %v252_v59 = vmul.f32 4.0, %v1053_v53  ;;  %vm256_vm4 = vweird.f32 %v1053_v53 }
 0x1f3   :  { %v385_v37 = vsel %vm380_vm3, %v377_v30, %v903_v36  ;;  %v955_v30 = vor.u32 %v1023_v28, %v954_v27  ;;  %v1039_v36 = vld [vmem:[%s1815_s12] ss:$0 sm:$0xff]  ;;  %v624_v28 = vld [vmem:[%s1820_s17 + $0x98] sm:$0xff]  ;;  %s856_s12 = sshll.u32 %s1094_s3, 4  ;;  %s857_s12 = int_to_ptr.vmem [resolvable:$true] %s856_s12 }
 0x1f4   :  { %v386_v38 = vpack.c.bf16 %v385_v37, %v385_v37  ;;  %v253_v63 = vsub.f32 1.0, %v252_v59  ;;  %v657_v59 = vld [vmem:[%s1820_s17 + $0x1a0] sm:$0xff] }
 0x1f5   :  { %576 = vmatpush.bf16.msrb.mxu0 %v955_v30  ;;  %694 = vmatpush.msrb.mxu2 %v657_v59  ;;  %v1041_v27 = vld [vmem:[%s1811_s8] ss:$0 sm:$0xff]  ;;  %v608_v59 = vld [vmem:[%s1820_s17 + $0x18] sm:$0xff] }
 0x1f6   :  { %463 = vmatmul.bf16.vlgmr.msra.gmra.mxu2 %v386_v38  ;;  %v254_v3 = vmul.f32 %v1053_v53, %v253_v63  ;;  %v623_v63 = vld [vmem:[%s1820_s17 + $0x90] sm:$0xff] }
 0x1f7   :  { %695 = vmatpush.msrb.mxu2 %v655_v0  ;;  %v638_v0 = vld [vmem:[%s1820_s17 + $0x108] sm:$0xff] }
 0x1f8   :  { %v255_v7 = vadd.f32 %v1053_v53, %v254_v3  ;;  %v664_v3 = vld [vmem:[%s1820_s17 + $0x1d8] sm:$0xff] }
 0x1f9   :  { %731 = vmatpush.msra.mxu1 %v664_v3  ;;  %696 = vmatpush.msrb.mxu2 %v653_v5 }
 0x1fa   :  { %v257_v8 = vsel %vm256_vm4, %v1053_v53, %v255_v7  ;;  %v627_v53 = vld [vmem:[%s1820_s17 + $0xb0] sm:$0xff] }
 0x1fb   :  { %673 = vmatpush.msra.mxu3 %v627_v53  ;;  %697 = vmatpush.msrb.mxu2 %v651_v10  ;;  %v612_v53 = vld [vmem:[%s1820_s17 + $0x38] sm:$0xff] }
 0x1fd   :  { %674 = vmatpush.msra.mxu3 %v625_v58  ;;  %698 = vmatpush.msrb.mxu2 %v649_v18 }
 0x1ff   :  { %675 = vmatpush.msra.mxu3 %v623_v63 }
 0x201   :  { %676 = vmatpush.msra.mxu3 %v621_v4 }
 0x203   :  { %677 = vmatpush.msra.mxu3 %v619_v9 }
 0x25a   :  { %v250_v14 = vpop.xlane.xlu0 %249 }
 0x25b   :  { %v258_v17 = vmul.f32 %v257_v8, %v250_v14  ;;  %v1040_v14 = vld [vmem:[%s1810_s7] ss:$0 sm:$0xff] }
 0x25d   :  { %v1485_v20 = vsub.f32 %v1408_v31, %v258_v17  ;;  %v946_v31 = vld [vmem:[%s1816_s13 + $0x10] sm:$0xf]  ;;  %v617_v17 = vld [vmem:[%s1820_s17 + $0x60] sm:$0xff] }
 0x25e   :  { %v947_v33 = vor.u32 %v1021_v32, %v946_v31  ;;  %678 = vmatpush.msra.mxu3 %v617_v17  ;;  %v645_v31 = vld [vmem:[%s1820_s17 + $0x140] sm:$0xff]  ;;  %v622_v32 = vld [vmem:[%s1820_s17 + $0x88] sm:$0xff] }
 0x25f   :  { %v260_v24 = vmul.f32 %v1485_v20, %v1485_v20 }
 0x260   :  { %577 = vmatpush.bf16.msrb.mxu0 %v947_v33  ;;  %679 = vmatpush.msra.mxu3 %v615_v23  ;;  %v654_v33 = vld [vmem:[%s1820_s17 + $0x188] sm:$0xff] }
 0x261   :  { %v261_v29 = vsel %vm247_vm2, %v260_v24, 0.0  ;;  %v647_v24 = vld [vmem:[%s1820_s17 + $0x150] sm:$0xff] }
 0x262   :  { %262 = vadd.xlane.f32.xlu0 %v261_v29  ;;  %v656_v29 = vld [vmem:[%s1820_s17 + $0x198] sm:$0xff]  ;;  %699 = vmatpush.msrb.mxu2 %v647_v24 }
 0x264   :  { %578 = vmatpush.bf16.msrb.mxu0 %v939_v35  ;;  %700 = vmatpush.msrb.mxu2 %v645_v31  ;;  %v643_v35 = vld [vmem:[%s1820_s17 + $0x130] sm:$0xff] }
 0x266   :  { %701 = vmatpush.msrb.mxu2 %v643_v35 }
 0x268   :  { %709 = vmatpush.msra.mxu0 %v636_v55  ;;  %v610_v55 = vld [vmem:[%s1820_s17 + $0x28] sm:$0xff] }
 0x26a   :  { %710 = vmatpush.msra.mxu0 %v634_v61  ;;  %v640_v61 = vld [vmem:[%s1820_s17 + $0x118] sm:$0xff] }
 0x26c   :  { %711 = vmatpush.msra.mxu0 %v632_v1 }
 0x26e   :  { %712 = vmatpush.msra.mxu0 %v630_v6  ;;  %v487_v6 = vperm.slane %v485_v42, 0 }
 0x270   :  { %713 = vmatpush.msra.mxu0 %v628_v11 }
 0x272   :  { %714 = vmatpush.msra.mxu0 %v626_v19 }
 0x274   :  { %715 = vmatpush.msra.mxu0 %v624_v28 }
 0x276   :  { %716 = vmatpush.msra.mxu0 %v622_v32 }
 0x279   :  { %v464_v37 = vpop.f32.mrf.mxu2 }
 0x27a   :  { %v465_v38 = vadd.f32 %v1039_v36, %v464_v37  ;;  %v620_v36 = vld [vmem:[%s1820_s17 + $0x78] sm:$0xff] }
 0x27b   :  { %v652_v37 = vld [vmem:[%s1820_s17 + $0x178] sm:$0xff]  ;;  %717 = vmatpush.msra.mxu0 %v620_v36 }
 0x27c   :  { %v468_v39 = vpack.c.bf16 %v465_v38, %v465_v38  ;;  %v812_v36 = vld [vmem:[%s1822_s19 + $0x78] sm:$0xff] }
 0x27d   :  { %718 = vmatpush.msra.mxu0 %v618_v41 }
 0x27e   :  { %592 = vmatmul.bf16.vlgmr.msrb.gmra.mxu1 %v468_v39  ;;  %579 = vmatmul.bf16.vlgmr.msrb.gmra.mxu0 %v468_v39  ;;  %v609_v39 = vld [vmem:[%s1820_s17 + $0x20] sm:$0xff] }
 0x27f   :  { %719 = vmatpush.msra.mxu0 %v616_v46  ;;  %v807_v46 = vld [vmem:[%s1822_s19 + $0x50] sm:$0xff] }
 0x281   :  { %v466_v40 = vpop.f32.mrf.mxu2  ;;  %720 = vmatpush.msra.mxu0 %v614_v50  ;;  %v803_v50 = vld [vmem:[%s1822_s19 + $0x30] sm:$0xff] }
 0x282   :  { %v641_v40 = vld [vmem:[%s1820_s17 + $0x120] sm:$0xff] }
 0x283   :  { %702 = vmatpush.msrb.mxu2 %v641_v40  ;;  %721 = vmatpush.msra.mxu0 %v612_v53  ;;  %v810_v40 = vld [vmem:[%s1822_s19 + $0x68] sm:$0xff]  ;;  %v800_v53 = vld [vmem:[%s1822_s19 + $0x18] sm:$0xff] }
 0x285   :  { %722 = vmatpush.msra.mxu0 %v610_v55  ;;  %v798_v55 = vld [vmem:[%s1822_s19 + $0x8] sm:$0xff] }
 0x287   :  { %723 = vmatpush.msra.mxu0 %v608_v59 }
 0x289   :  { %724 = vmatpush.msra.mxu0 %v606_v62 }
 0x2d5   :  { %v263_v43 = vpop.xlane.xlu0 %262 }
 0x2d6   :  { %v264_v44 = vmul.f32 %v263_v43, %v257_v8  ;;  %v662_v8 = vld [vmem:[%s1820_s17 + $0x1c8] sm:$0xff] }
 0x2d7   :  { %732 = vmatpush.msra.mxu1 %v662_v8  ;;  %v650_v43 = vld [vmem:[%s1820_s17 + $0x168] sm:$0xff] }
 0x2d8   :  { %v265_v45 = vadd.f32 1e-05, %v264_v44  ;;  %v607_v44 = vld [vmem:[%s1820_s17 + $0x10] sm:$0xff] }
 0x2d9   :  { %733 = vmatpush.msra.mxu1 %v660_v15 }
 0x2da   :  { %1054 = vrsqrt.f32 %v265_v45  ;;  %vm272_vm6 = vweird.f32 %v265_v45 }
 0x2db   :  { %734 = vmatpush.msra.mxu1 %v658_v22 }
 0x2dd   :  { %735 = vmatpush.msra.mxu1 %v656_v29  ;;  %v768_v29 = vld [vmem:[%s1821_s18] sm:$0xf] }
 0x2df   :  { %736 = vmatpush.msra.mxu1 %v654_v33 }
 0x2e0   :  { %v1055_v52 = vpop.eup %1054 }
 0x2e1   :  { %v267_v56 = vmul.f32 %v1055_v52, %v265_v45  ;;  %vm273_vm5 = vweird.f32 %v1055_v52  ;;  %737 = vmatpush.msra.mxu1 %v652_v37  ;;  %v639_v45 = vld [vmem:[%s1820_s17 + $0x110] sm:$0xff] }
 0x2e2   :  { %vm1599_vm7 = vmor %vm272_vm6, %vm273_vm5  ;;  %703 = vmatpush.msrb.mxu2 %v639_v45  ;;  %v811_v37 = vld [vmem:[%s1822_s19 + $0x70] sm:$0xff] }
 0x2e3   :  { %v268_v60 = vmul.f32 %v1055_v52, %v267_v56  ;;  %738 = vmatpush.msra.mxu1 %v650_v43  ;;  %v642_v56 = vld [vmem:[%s1820_s17 + $0x128] sm:$0xff] }
 0x2e4   :  { %704 = vmatpush.msrb.mxu2 %v637_v49  ;;  %v804_v49 = vld [vmem:[%s1822_s19 + $0x38] sm:$0xff] }
 0x2e5   :  { %v269_v2 = vmul.f32 0.5, %v268_v60  ;;  %739 = vmatpush.msra.mxu1 %v648_v47  ;;  %v806_v47 = vld [vmem:[%s1822_s19 + $0x48] sm:$0xff] }
 0x2e6   :  { %813 = vmatpush.msra.mxu2 %v812_v36 }
 0x2e7   :  { %v270_v7 = vsub.f32 1.5, %v269_v2  ;;  %740 = vmatpush.msra.mxu1 %v646_v51  ;;  %v802_v51 = vld [vmem:[%s1822_s19 + $0x28] sm:$0xff] }
 0x2e8   :  { %814 = vmatpush.msra.mxu2 %v811_v37 }
 0x2e9   :  { %v271_v12 = vmul.f32 %v1055_v52, %v270_v7  ;;  %741 = vmatpush.msra.mxu1 %v644_v54  ;;  %v799_v54 = vld [vmem:[%s1822_s19 + $0x10] sm:$0xff] }
 0x2ea   :  { %815 = vmatpush.msra.mxu2 %v810_v40 }
 0x2eb   :  { %v275_v21 = vsel %vm1599_vm7, %v1055_v52, %v271_v12  ;;  %v488_v52 = vperm.slane %v485_v42, 1  ;;  %742 = vmatpush.msra.mxu1 %v642_v56  ;;  %v809_v42 = vld [vmem:[%s1822_s19 + $0x60] sm:$0xff] }
 0x2ec   :  { %v276_v26 = vmul.f32 %v275_v21, %v1485_v20  ;;  %v613_v20 = vld [vmem:[%s1820_s17 + $0x40] sm:$0xff]  ;;  %816 = vmatpush.msra.mxu2 %v809_v42 }
 0x2ed   :  { %680 = vmatpush.msra.mxu3 %v613_v20  ;;  %743 = vmatpush.msra.mxu1 %v640_v61  ;;  %v797_v56 = vld [vmem:[%s1822_s19] sm:$0xff] }
 0x2ee   :  { %v281_v30 = vmul.f32 %v1040_v14, %v276_v26 }
 0x2ef   :  { %681 = vmatpush.msra.mxu3 %v611_v34  ;;  %744 = vmatpush.msra.mxu1 %v638_v0 }
 0x2f0   :  { %v1651_v25 = vadd.f32 %v1041_v27, %v281_v30 }
 0x2f1   :  { %682 = vmatpush.msra.mxu3 %v609_v39 }
 0x2f2   :  { %v287_v38 = vsel %vm247_vm2, %v1651_v25, -inf }
 0x2f3   :  { %288 = vmax.xlane.f32.xlu1 %v287_v38  ;;  %683 = vmatpush.msra.mxu3 %v607_v44  ;;  %v808_v44 = vld [vmem:[%s1822_s19 + $0x58] sm:$0xff] }
 0x2f4   :  { %817 = vmatpush.msra.mxu2 %v808_v44 }
 0x2f5   :  { %684 = vmatpush.msra.mxu3 %v605_v48  ;;  %v805_v48 = vld [vmem:[%s1822_s19 + $0x40] sm:$0xff] }
 0x2f6   :  { %818 = vmatpush.msra.mxu2 %v807_v46 }
 0x2f7   :  { %1000 = vmatpush.msk.msrb.mxu3 %vm772_vm8, %v768_v29 }
 0x2f8   :  { %819 = vmatpush.msra.mxu2 %v806_v47 }
 0x2fa   :  { %820 = vmatpush.msra.mxu2 %v805_v48 }
 0x2fb   :  { %v593_v57 = vpop.f32.mrf.mxu1  ;;  %v580_v58 = vpop.f32.mrf.mxu0 }
 0x2fc   :  { %v594_v60 = vadd.f32 %v593_v57, %v488_v52  ;;  %v581_v7 = vadd.f32 %v580_v58, %v487_v6  ;;  %821 = vmatpush.msra.mxu2 %v804_v49  ;;  %v801_v52 = vld [vmem:[%s1822_s19 + $0x20] sm:$0xff] }
 0x2fe   :  { %v597_v63 = vsub.f32 0.0, %v594_v60  ;;  %822 = vmatpush.msra.mxu2 %v803_v50  ;;  %v1042_v60 = vld [vmem:[%s1818_s15] ss:$0 sm:$0xff] }
 0x300   :  { %v598_v1 = vmul.f32 1.442695, %v597_v63  ;;  %823 = vmatpush.msra.mxu2 %v802_v51  ;;  %v1043_v63 = vld [vmem:[%s1819_s16] ss:$0 sm:$0xff] }
 0x302   :  { %1056 = vpow2.f32 %v598_v1  ;;  %824 = vmatpush.msra.mxu2 %v801_v52 }
 0x303   :  { %v582_v2 = vpop.f32.mrf.mxu0  ;;  %v595_v3 = vpop.f32.mrf.mxu1 }
 0x304   :  { %825 = vmatpush.msra.mxu2 %v800_v53 }
 0x306   :  { %826 = vmatpush.msra.mxu2 %v799_v54 }
 0x308   :  { %v1057_v4 = vpop.eup %1056  ;;  %827 = vmatpush.msra.mxu2 %v798_v55 }
 0x309   :  { %v600_v5 = vadd.f32 1.0, %v1057_v4 }
 0x30a   :  { %828 = vmatpush.msra.mxu2 %v797_v56 }
 0x30b   :  { %1058 = vrcp.f32 %v600_v5 }
 0x311   :  { %v1059_v8 = vpop.eup %1058 }
 0x312   :  { %v602_v9 = vmul.f32 %v1059_v8, %v581_v7 }
 0x314   :  { %v1731_v10 = vadd.f32 %v602_v9, %v1251_v16 }
 0x316   :  { %685 = vmatmul.f32.vlgmr.msra.gmra.mxu3 %v1731_v10  ;;  %v604_v11 = vmul.f32 %v1731_v10, %v1731_v10  ;;  %725 = vmatmul.f32.vlgmr.msra.gmra.mxu0 %v1731_v10 }
 0x318   :  { %705 = vmatmul.f32.vlgmr.msrb.gmra.mxu2 %v604_v11  ;;  %745 = vmatmul.f32.vlgmr.msra.gmra.mxu1 %v604_v11 }
 0x366   :  { %v289_v12 = vpop.xlane.xlu1 %288 }
 0x367   :  { %v290_v13 = vsub.f32 %v1651_v25, %v289_v12 }
 0x369   :  { %v291_v14 = vmul.f32 1.442695, %v290_v13 }
 0x36b   :  { %1060 = vpow2.f32 %v291_v14 }
 0x371   :  { %v1061_v15 = vpop.eup %1060 }
 0x372   :  { %v293_v17 = vsel %vm247_vm2, %v1061_v15, 0.0 }
 0x373   :  { %294 = vadd.xlane.f32.xlu1 %v293_v17 }
 0x393   :  { %v726_v21 = vpop.f32.mrf.mxu0 }
 0x395   :  { %v746_v22 = vpop.f32.mrf.mxu1 }
 0x396   :  { %v747_v24 = vadd.f32 %v746_v22, %v726_v21 }
 0x399   :  { %v686_v16 = vpop.f32.mrf.mxu3 }
 0x39b   :  { %v706_v18 = vpop.f32.mrf.mxu2 }
 0x39c   :  { %v707_v19 = vadd.f32 %v706_v18, %v686_v16 }
 0x39e   :  { %v749_v23 = vmul.f32 %v707_v19, %v707_v19 }
 0x3a0   :  { %v750_v26 = vsub.f32 %v747_v24, %v749_v23 }
 0x3a2   :  { %v751_v27 = vmax.f32 %v750_v26, 0.0 }
 0x3a4   :  { %v752_v28 = vadd.f32 1e-05, %v751_v27 }
 0x3a6   :  { %1062 = vrsqrt.f32 %v752_v28  ;;  %vm759_vm9 = vweird.f32 %v752_v28 }
 0x3ac   :  { %v1063_v30 = vpop.eup %1062 }
 0x3ad   :  { %v754_v20 = vmul.f32 %v1063_v30, %v752_v28  ;;  %vm760_vm10 = vweird.f32 %v1063_v30 }
 0x3ae   :  { %vm761_vm11 = vmor %vm759_vm9, %vm760_vm10 }
 0x3af   :  { %v755_v31 = vmul.f32 %v1063_v30, %v754_v20 }
 0x3b1   :  { %v756_v32 = vmul.f32 0.5, %v755_v31 }
 0x3b3   :  { %v757_v25 = vsub.f32 1.5, %v756_v32 }
 0x3b5   :  { %v758_v34 = vmul.f32 %v1063_v30, %v757_v25 }
 0x3b7   :  { %v762_v39 = vsel %vm761_vm11, %v1063_v30, %v758_v34 }
 0x3e6   :  { %v295_v33 = vpop.xlane.xlu1 %294 }
 0x3e7   :  { %1064 = vrcp.f32 %v295_v33 }
 0x3ed   :  { %v1065_v35 = vpop.eup %1064 }
 0x3ee   :  { %v297_v38 = vmul.f32 %v1065_v35, %v1061_v15 }
 0x3f0   :  { %v763_v41 = vmul.f32 %v762_v39, %v297_v38 }
 0x3f2   :  { %1001 = vmatmul.msk.f32.vlgmr.msrb.gmra.mxu3 %vm247_vm2, %v763_v41  ;;  %v764_v43 = vmul.f32 %v763_v41, %v707_v19 }
 0x3f4   :  { %v765_v45 = vsel %vm247_vm2, %v764_v43, 0.0 }
 0x3f5   :  { %766 = vadd.xlane.f32.xlu2 %v765_v45 }
 0x40d   :  { %845 = vrot.lane.b32.xlu2 %v297_v38, %s1093_s28 }
 0x468   :  { %v767_v59 = vpop.xlane.xlu2 %766 }
 0x470   :  { %v846_v2 = vpop.permute.xlu2 %845 }
 0x475   :  { %v793_v57 = vpop.f32.mrf.mxu3 }
 0x476   :  { %v796_v58 = vmul.f32 %v793_v57, %v1731_v10 }
 0x478   :  { %829 = vmatmul.f32.vlgmr.msra.gmra.mxu2 %v796_v58 }
 0x4fb   :  { %v830_v61 = vpop.f32.mrf.mxu2 }
 0x4fc   :  { %v834_v62 = vsub.f32 %v830_v61, %v767_v59 }
 0x4fe   :  { %v838_v0 = vmul.f32 %v1042_v60, %v834_v62 }
 0x500   :  { %v843_v1 = vadd.f32 %v1043_v63, %v838_v0 }
 0x502   :  { %v848_v3 = vsel %vm159_vm0, %v843_v1, %v846_v2 }
 0x503   :  { %850 = vst.msk [vmem:[#allocation2] sm:$0xff] %vm849_vm12, %v848_v3 }
 0x504   :  { %861 = dma.vmem_to_hbm [thread:$0]  %s857_s12, 128, %s859_s26, [#allocation3]  }
 0x505   :  { %1090 = dma.done.wait [#allocation3], 128  }
 0x506   :  { %1091 = vsyncadd [#allocation3], 4294967168 }
 0x507   :  { %866 = vsyncpa [#allocation3], 1 }

</bundles_post_ra>
